<compile_context>
chip_gen: v7x
topology: tpu7x:2x2x1
jax: 0.10.0
libtpu: 0.0.40
codegen_flags: <defaults>
</compile_context>

<pallas_src>
import functools

import jax
import jax.numpy as jnp
from jax.experimental import pallas as pl
from jax.experimental.pallas import tpu as pltpu

N_VAE_DIS = 16
IN_F = N_VAE_DIS - 1   # 15
HID = 32
OUT_F = 1
BN_EPS = 1e-5
NEG_SLOPE = 0.2


def _leaky_relu(h):
    # max(h, 0.2*h) == LeakyReLU(0.2) for slope in [0, 1]; 2 VALU ops vs 3.
    return jnp.maximum(h, NEG_SLOPE * h)


# --------------------------------------------------------------------------
# fused kernel: grid = (phase, tile); everything batch-on-lanes.
#   phase 0: accumulate per-feature sum / sumsq of h1 = W1 @ x        (b1 cancels)
#   phase 1: fold BN1 (tile 0), accumulate stats of h2 = W2 @ a1      (b2 cancels)
#   phase 2: fold BN2 + padded-column correction (tile 0), full forward
# Scratch st*_a / st*_b hold [sum, sumsq] during stats, [scale, shift] after fold.
# --------------------------------------------------------------------------
def _fused_kernel(x_ref, w1_ref, w2_ref, w3_ref, g1_ref, be1_ref,
                  g2_ref, be2_ref, b3_ref, o_ref,
                  st1_a, st1_b, st2_a, st2_b, *, n_true, n_pad):
    phase = pl.program_id(0)
    tile = pl.program_id(1)
    inv_n = 1.0 / float(n_true)

    @pl.when(jnp.logical_and(phase == 0, tile == 0))
    def _init():
        st1_a[...] = jnp.zeros_like(st1_a)
        st1_b[...] = jnp.zeros_like(st1_b)
        st2_a[...] = jnp.zeros_like(st2_a)
        st2_b[...] = jnp.zeros_like(st2_b)

    # ---- phase 0: BN1 batch statistics -----------------------------------
    # Padded columns of x are exactly zero and there is no bias, so they
    # contribute exactly 0 to both sums -> no mask / correction needed.
    @pl.when(phase == 0)
    def _stats1():
        h1 = jnp.dot(w1_ref[...], x_ref[...],
                     preferred_element_type=jnp.float32)        # (HID, tile_n)
        st1_a[...] += jnp.sum(h1, axis=-1, keepdims=True)
        st1_b[...] += jnp.sum(h1 * h1, axis=-1, keepdims=True)

    # ---- BN1 fold at the phase-0 -> phase-1 boundary ----------------------
    @pl.when(jnp.logical_and(phase == 1, tile == 0))
    def _fold_bn1():
        mu = st1_a[...] * inv_n
        var = jnp.maximum(st1_b[...] * inv_n - mu * mu, 0.0)
        scale = g1_ref[...] * jax.lax.rsqrt(var + BN_EPS)
        shift = be1_ref[...] - scale * mu
        st1_a[...] = scale
        st1_b[...] = shift

    # ---- phase 1: BN2 batch statistics ------------------------------------
    @pl.when(phase == 1)
    def _stats2():
        h1 = jnp.dot(w1_ref[...], x_ref[...],
                     preferred_element_type=jnp.float32)
        a1 = _leaky_relu(h1 * st1_a[...] + st1_b[...])           # scale/shift
        h2 = jnp.dot(w2_ref[...], a1,
                     preferred_element_type=jnp.float32)         # (HID, tile_n)
        st2_a[...] += jnp.sum(h2, axis=-1, keepdims=True)
        st2_b[...] += jnp.sum(h2 * h2, axis=-1, keepdims=True)

    # ---- BN2 fold (+ exact padded-column correction) ----------------------
    @pl.when(jnp.logical_and(phase == 2, tile == 0))
    def _fold_bn2():
        s = st2_a[...]
        q = st2_b[...]
        n_fake = n_pad - n_true                 # static Python int
        if n_fake > 0:
            # every padded column produced a1 = leaky(shift1), h2 = W2 @ a1;
            # subtract that constant contribution instead of masking per-element.
            a1p = _leaky_relu(st1_b[...])                        # (HID, 1)
            h2p = jnp.dot(w2_ref[...], a1p,
                          preferred_element_type=jnp.float32)    # (HID, 1)
            s = s - float(n_fake) * h2p
            q = q - float(n_fake) * (h2p * h2p)
        mu = s * inv_n
        var = jnp.maximum(q * inv_n - mu * mu, 0.0)
        scale = g2_ref[...] * jax.lax.rsqrt(var + BN_EPS)
        shift = be2_ref[...] - scale * mu
        st2_a[...] = scale
        st2_b[...] = shift

    # ---- phase 2: full forward, lane-dense (1, tile_n) output -------------
    @pl.when(phase == 2)
    def _final():
        h1 = jnp.dot(w1_ref[...], x_ref[...],
                     preferred_element_type=jnp.float32)
        a1 = _leaky_relu(h1 * st1_a[...] + st1_b[...])
        h2 = jnp.dot(w2_ref[...], a1,
                     preferred_element_type=jnp.float32)
        a2 = _leaky_relu(h2 * st2_a[...] + st2_b[...])
        z = jnp.dot(w3_ref[...], a2,
                    preferred_element_type=jnp.float32) + b3_ref[...]  # (1, tile_n)
        # sigmoid: exp and reciprocal both land on the (otherwise idle) EUP slot.
        o_ref[...] = pl.reciprocal(1.0 + jnp.exp(-z), approx=True)


# --------------------------------------------------------------------------
# host-side wrapper
# --------------------------------------------------------------------------
def classifier_forward(x, params, *, tile_n=None):
    """x: (N, 15) float32 -> (N, 1) float32."""
    n, f = x.shape
    assert f == IN_F

    if tile_n is None:
        # derive from N: one big tile for small/medium batches, cap at 8192.
        tile_n = min(8192, ((n + 127) // 128) * 128)
    assert tile_n % 128 == 0 and tile_n >= 128

    num_tiles = pl.cdiv(n, tile_n)
    n_pad = num_tiles * tile_n

    # batch-on-lanes layout: transpose once on host, pad lanes to n_pad.
    x_t = x.T                                                    # (IN_F, n)
    if n_pad != n:
        x_t = jnp.pad(x_t, ((0, 0), (0, n_pad - n)))

    w1t = params["w1"].T                                         # (HID, IN_F)
    w2t = params["w2"].T                                         # (HID, HID)
    w3t = params["w3"].T                                         # (OUT_F, HID)
    g1t = params["g1"].reshape(HID, 1)
    be1t = params["be1"].reshape(HID, 1)
    g2t = params["g2"].reshape(HID, 1)
    be2t = params["be2"].reshape(HID, 1)
    b3 = params["b3"].reshape(1, 1)

    x_spec = pl.BlockSpec((IN_F, tile_n), lambda p, i: (0, i))
    const = lambda a: pl.BlockSpec(a.shape, lambda p, i: (0, 0))

    flops = 2 * n_pad * (3 * IN_F * HID + 2 * HID * HID + HID * OUT_F)

    out_t = pl.pallas_call(
        functools.partial(_fused_kernel, n_true=n, n_pad=n_pad),
        out_shape=jax.ShapeDtypeStruct((1, n_pad), jnp.float32),
        grid=(3, num_tiles),
        in_specs=[x_spec, const(w1t), const(w2t), const(w3t),
                  const(g1t), const(be1t), const(g2t), const(be2t), const(b3)],
        out_specs=pl.BlockSpec((1, tile_n), lambda p, i: (0, i)),
        scratch_shapes=[pltpu.VMEM((HID, 1), jnp.float32) for _ in range(4)],
        compiler_params=pltpu.CompilerParams(
            dimension_semantics=("arbitrary", "arbitrary")),
        cost_estimate=pl.CostEstimate(
            flops=flops,
            transcendentals=n_pad,
            bytes_accessed=(3 * IN_F + 1) * n_pad * 4),
    )(x_t, w1t, w2t, w3t, g1t, be1t, g2t, be2t, b3)

    return out_t[0, :n].reshape(n, OUT_F)


# --------------------------------------------------------------------------
# init + pure-JAX reference (PyTorch semantics, incl. b1/b2 which BN cancels)
# --------------------------------------------------------------------------
def init_params(key):
    ks = jax.random.split(key, 6)

    def lin(kw, kb, fan_in, fan_out):
        bound = 1.0 / jnp.sqrt(jnp.float32(fan_in))
        w = jax.random.uniform(kw, (fan_in, fan_out), jnp.float32, -bound, bound)
        b = jax.random.uniform(kb, (1, fan_out), jnp.float32, -bound, bound)
        return w, b

    w1, b1 = lin(ks[0], ks[1], IN_F, HID)
    w2, b2 = lin(ks[2], ks[3], HID, HID)
    w3, b3 = lin(ks[4], ks[5], HID, OUT_F)
    return {
        "w1": w1, "b1": b1,
        "g1": jnp.ones((1, HID), jnp.float32), "be1": jnp.zeros((1, HID), jnp.float32),
        "w2": w2, "b2": b2,
        "g2": jnp.ones((1, HID), jnp.float32), "be2": jnp.zeros((1, HID), jnp.float32),
        "w3": w3, "b3": b3,
    }


def _reference_forward(x, p):
    h = x @ p["w1"] + p["b1"]
    mu = h.mean(0, keepdims=True)
    var = ((h - mu) ** 2).mean(0, keepdims=True)
    h = (h - mu) / jnp.sqrt(var + BN_EPS) * p["g1"] + p["be1"]
    h = jnp.where(h >= 0, h, NEG_SLOPE * h)
    h = h @ p["w2"] + p["b2"]
    mu = h.mean(0, keepdims=True)
    var = ((h - mu) ** 2).mean(0, keepdims=True)
    h = (h - mu) / jnp.sqrt(var + BN_EPS) * p["g2"] + p["be2"]
    h = jnp.where(h >= 0, h, NEG_SLOPE * h)
    z = h @ p["w3"] + p["b3"]
    return 1.0 / (1.0 + jnp.exp(-z))


if __name__ == "__main__":
    key = jax.random.PRNGKey(0)
    k_x, k_p, k_x2 = jax.random.split(key, 3)
    params = init_params(k_p)

    # Small shape consistent with the module (single 128-wide tile, padded
    # columns handled by the analytic stats correction).
    x_small = jax.random.normal(k_x, (8, IN_F), jnp.float32)
    out = jax.block_until_ready(classifier_forward(x_small, params))
    ref = _reference_forward(x_small, params)
    assert out.shape == (8, OUT_F)
    assert jnp.allclose(out, ref, atol=5e-3, rtol=5e-3), \
        float(jnp.max(jnp.abs(out - ref)))

    # Multi-tile path: exercises the phase/tile grid, the resident stats
    # accumulators, the padded-column correction and the lane-dense tiled output.
    x_big = jax.random.normal(k_x2, (1000, IN_F), jnp.float32)
    out_b = jax.block_until_ready(classifier_forward(x_big, params, tile_n=256))
    ref_b = _reference_forward(x_big, params)
    assert out_b.shape == (1000, OUT_F)
    assert jnp.allclose(out_b, ref_b, atol=5e-3, rtol=5e-3), \
        float(jnp.max(jnp.abs(out_b - ref_b)))

    # Default tile derivation (single 1024-wide tile for N=1000).
    out_d = jax.block_until_ready(classifier_forward(x_big, params))
    assert jnp.allclose(out_d, ref_b, atol=5e-3, rtol=5e-3), \
        float(jnp.max(jnp.abs(out_d - ref_b)))

    print("KERNEL_OK")
</pallas_src>

<mosaic_0001>
module attributes {stable_mosaic.version = 11 : i64} {
  func.func @_fused_kernel(%arg0: i32, %arg1: i32, %arg2: memref<15x128xf32, #tpu.memory_space<vmem>>, %arg3: memref<32x15xf32, #tpu.memory_space<vmem>>, %arg4: memref<32x32xf32, #tpu.memory_space<vmem>>, %arg5: memref<1x32xf32, #tpu.memory_space<vmem>>, %arg6: memref<32x1xf32, #tpu.memory_space<vmem>>, %arg7: memref<32x1xf32, #tpu.memory_space<vmem>>, %arg8: memref<32x1xf32, #tpu.memory_space<vmem>>, %arg9: memref<32x1xf32, #tpu.memory_space<vmem>>, %arg10: memref<1x1xf32, #tpu.memory_space<vmem>>, %arg11: memref<1x128xf32, #tpu.memory_space<vmem>>, %arg12: memref<32x1xf32, #tpu.memory_space<vmem>>, %arg13: memref<32x1xf32, #tpu.memory_space<vmem>>, %arg14: memref<32x1xf32, #tpu.memory_space<vmem>>, %arg15: memref<32x1xf32, #tpu.memory_space<vmem>>) attributes {dimension_semantics = [#tpu.dimension_semantics<arbitrary>, #tpu.dimension_semantics<arbitrary>], iteration_bounds = array<i64: 3, 1>, scalar_prefetch = 0 : i64, scratch_operands = 4 : i64, tpu.core_type = #tpu.core_type<tc>, window_params = [{transform_indices = @transform_0, window_bounds = array<i64: 15, 128>}, {pipeline_mode = #tpu.pipeline_mode<synchronous>, transform_indices = @transform_1, window_bounds = array<i64: 32, 15>}, {pipeline_mode = #tpu.pipeline_mode<synchronous>, transform_indices = @transform_2, window_bounds = array<i64: 32, 32>}, {pipeline_mode = #tpu.pipeline_mode<synchronous>, transform_indices = @transform_3, window_bounds = array<i64: 1, 32>}, {pipeline_mode = #tpu.pipeline_mode<synchronous>, transform_indices = @transform_4, window_bounds = array<i64: 32, 1>}, {pipeline_mode = #tpu.pipeline_mode<synchronous>, transform_indices = @transform_5, window_bounds = array<i64: 32, 1>}, {pipeline_mode = #tpu.pipeline_mode<synchronous>, transform_indices = @transform_6, window_bounds = array<i64: 32, 1>}, {pipeline_mode = #tpu.pipeline_mode<synchronous>, transform_indices = @transform_7, window_bounds = array<i64: 32, 1>}, {pipeline_mode = #tpu.pipeline_mode<synchronous>, transform_indices = @transform_8, window_bounds = array<i64: 1, 1>}, {transform_indices = @transform_9, window_bounds = array<i64: 1, 128>}]} {
    %c0_i32 = arith.constant 0 : i32
    %0 = arith.cmpi eq, %arg0, %c0_i32 : i32
    %c0_i32_0 = arith.constant 0 : i32
    %1 = arith.cmpi eq, %arg1, %c0_i32_0 : i32
    %2 = arith.andi %0, %1 : i1
    %3 = arith.extui %2 : i1 to i32
    %c0_i32_1 = arith.constant 0 : i32
    %4 = arith.cmpi ne, %3, %c0_i32_1 : i32
    scf.if %4 {
      %cst = arith.constant 0.000000e+00 : f32
      %24 = vector.broadcast %cst : f32 to vector<32x1xf32>
      %c0 = arith.constant 0 : index
      %c0_12 = arith.constant 0 : index
      %25 = vector.load %arg12[%c0, %c0_12] : memref<32x1xf32, #tpu.memory_space<vmem>>, vector<32x1xf32>
      tpu.vector_store %arg12[%c0, %c0_12], %24 {strides = array<i32>} : memref<32x1xf32, #tpu.memory_space<vmem>>, vector<32x1xf32>,
      %cst_13 = arith.constant 0.000000e+00 : f32
      %26 = vector.broadcast %cst_13 : f32 to vector<32x1xf32>
      %c0_14 = arith.constant 0 : index
      %c0_15 = arith.constant 0 : index
      %27 = vector.load %arg13[%c0_14, %c0_15] : memref<32x1xf32, #tpu.memory_space<vmem>>, vector<32x1xf32>
      tpu.vector_store %arg13[%c0_14, %c0_15], %26 {strides = array<i32>} : memref<32x1xf32, #tpu.memory_space<vmem>>, vector<32x1xf32>,
      %cst_16 = arith.constant 0.000000e+00 : f32
      %28 = vector.broadcast %cst_16 : f32 to vector<32x1xf32>
      %c0_17 = arith.constant 0 : index
      %c0_18 = arith.constant 0 : index
      %29 = vector.load %arg14[%c0_17, %c0_18] : memref<32x1xf32, #tpu.memory_space<vmem>>, vector<32x1xf32>
      tpu.vector_store %arg14[%c0_17, %c0_18], %28 {strides = array<i32>} : memref<32x1xf32, #tpu.memory_space<vmem>>, vector<32x1xf32>,
      %cst_19 = arith.constant 0.000000e+00 : f32
      %30 = vector.broadcast %cst_19 : f32 to vector<32x1xf32>
      %c0_20 = arith.constant 0 : index
      %c0_21 = arith.constant 0 : index
      %31 = vector.load %arg15[%c0_20, %c0_21] : memref<32x1xf32, #tpu.memory_space<vmem>>, vector<32x1xf32>
      tpu.vector_store %arg15[%c0_20, %c0_21], %30 {strides = array<i32>} : memref<32x1xf32, #tpu.memory_space<vmem>>, vector<32x1xf32>,
    } else {
    }
    %c0_i32_2 = arith.constant 0 : i32
    %5 = arith.cmpi eq, %arg0, %c0_i32_2 : i32
    %6 = arith.extui %5 : i1 to i32
    %c0_i32_3 = arith.constant 0 : i32
    %7 = arith.cmpi ne, %6, %c0_i32_3 : i32
    scf.if %7 {
      %c0 = arith.constant 0 : index
      %c0_12 = arith.constant 0 : index
      %24 = vector.load %arg3[%c0, %c0_12] : memref<32x15xf32, #tpu.memory_space<vmem>>, vector<32x15xf32>
      %c0_13 = arith.constant 0 : index
      %c0_14 = arith.constant 0 : index
      %25 = vector.load %arg2[%c0_13, %c0_14] : memref<15x128xf32, #tpu.memory_space<vmem>>, vector<15x128xf32>
      %cst = arith.constant dense<0.000000e+00> : vector<32x128xf32>
      %26 = tpu.matmul %24, %25, %cst {dimension_numbers = #tpu.dot_dimension_numbers<[1], [0], [0], [1], [0, 0, 1, 1], [], []>} : vector<32x15xf32>, vector<15x128xf32>, vector<32x128xf32> -> vector<32x128xf32>
      %c0_15 = arith.constant 0 : index
      %c0_16 = arith.constant 0 : index
      %27 = vector.load %arg12[%c0_15, %c0_16] : memref<32x1xf32, #tpu.memory_space<vmem>>, vector<32x1xf32>
      %cst_17 = arith.constant dense<0.000000e+00> : vector<32xf32>
      %28 = vector.multi_reduction <add>, %26, %cst_17 [1] : vector<32x128xf32> to vector<32xf32>
      %29 = vector.shape_cast %28 : vector<32xf32> to vector<32x1xf32>
      %30 = arith.addf %27, %29 : vector<32x1xf32>
      %c0_18 = arith.constant 0 : index
      %c0_19 = arith.constant 0 : index
      %31 = vector.load %arg12[%c0_18, %c0_19] : memref<32x1xf32, #tpu.memory_space<vmem>>, vector<32x1xf32>
      tpu.vector_store %arg12[%c0_18, %c0_19], %30 {strides = array<i32>} : memref<32x1xf32, #tpu.memory_space<vmem>>, vector<32x1xf32>,
      %c0_20 = arith.constant 0 : index
      %c0_21 = arith.constant 0 : index
      %32 = vector.load %arg13[%c0_20, %c0_21] : memref<32x1xf32, #tpu.memory_space<vmem>>, vector<32x1xf32>
      %33 = arith.mulf %26, %26 : vector<32x128xf32>
      %cst_22 = arith.constant dense<0.000000e+00> : vector<32xf32>
      %34 = vector.multi_reduction <add>, %33, %cst_22 [1] : vector<32x128xf32> to vector<32xf32>
      %35 = vector.shape_cast %34 : vector<32xf32> to vector<32x1xf32>
      %36 = arith.addf %32, %35 : vector<32x1xf32>
      %c0_23 = arith.constant 0 : index
      %c0_24 = arith.constant 0 : index
      %37 = vector.load %arg13[%c0_23, %c0_24] : memref<32x1xf32, #tpu.memory_space<vmem>>, vector<32x1xf32>
      tpu.vector_store %arg13[%c0_23, %c0_24], %36 {strides = array<i32>} : memref<32x1xf32, #tpu.memory_space<vmem>>, vector<32x1xf32>,
    } else {
    }
    %c1_i32 = arith.constant 1 : i32
    %8 = arith.cmpi eq, %arg0, %c1_i32 : i32
    %c0_i32_4 = arith.constant 0 : i32
    %9 = arith.cmpi eq, %arg1, %c0_i32_4 : i32
    %10 = arith.andi %8, %9 : i1
    %11 = arith.extui %10 : i1 to i32
    %c0_i32_5 = arith.constant 0 : i32
    %12 = arith.cmpi ne, %11, %c0_i32_5 : i32
    scf.if %12 {
      %c0 = arith.constant 0 : index
      %c0_12 = arith.constant 0 : index
      %24 = vector.load %arg12[%c0, %c0_12] : memref<32x1xf32, #tpu.memory_space<vmem>>, vector<32x1xf32>
      %cst = arith.constant 1.250000e-01 : f32
      %25 = vector.broadcast %cst : f32 to vector<32x1xf32>
      %26 = arith.mulf %24, %25 : vector<32x1xf32>
      %c0_13 = arith.constant 0 : index
      %c0_14 = arith.constant 0 : index
      %27 = vector.load %arg13[%c0_13, %c0_14] : memref<32x1xf32, #tpu.memory_space<vmem>>, vector<32x1xf32>
      %cst_15 = arith.constant 1.250000e-01 : f32
      %28 = vector.broadcast %cst_15 : f32 to vector<32x1xf32>
      %29 = arith.mulf %27, %28 : vector<32x1xf32>
      %30 = arith.mulf %26, %26 : vector<32x1xf32>
      %31 = arith.subf %29, %30 : vector<32x1xf32>
      %cst_16 = arith.constant 0.000000e+00 : f32
      %32 = vector.broadcast %cst_16 : f32 to vector<32x1xf32>
      %33 = arith.maximumf %31, %32 : vector<32x1xf32>
      %c0_17 = arith.constant 0 : index
      %c0_18 = arith.constant 0 : index
      %34 = vector.load %arg6[%c0_17, %c0_18] : memref<32x1xf32, #tpu.memory_space<vmem>>, vector<32x1xf32>
      %cst_19 = arith.constant 9.99999974E-6 : f32
      %35 = vector.broadcast %cst_19 : f32 to vector<32x1xf32>
      %36 = arith.addf %33, %35 : vector<32x1xf32>
      %37 = math.rsqrt %36 : vector<32x1xf32>
      %38 = arith.mulf %34, %37 : vector<32x1xf32>
      %c0_20 = arith.constant 0 : index
      %c0_21 = arith.constant 0 : index
      %39 = vector.load %arg7[%c0_20, %c0_21] : memref<32x1xf32, #tpu.memory_space<vmem>>, vector<32x1xf32>
      %40 = arith.mulf %38, %26 : vector<32x1xf32>
      %41 = arith.subf %39, %40 : vector<32x1xf32>
      %c0_22 = arith.constant 0 : index
      %c0_23 = arith.constant 0 : index
      %42 = vector.load %arg12[%c0_22, %c0_23] : memref<32x1xf32, #tpu.memory_space<vmem>>, vector<32x1xf32>
      tpu.vector_store %arg12[%c0_22, %c0_23], %38 {strides = array<i32>} : memref<32x1xf32, #tpu.memory_space<vmem>>, vector<32x1xf32>,
      %c0_24 = arith.constant 0 : index
      %c0_25 = arith.constant 0 : index
      %43 = vector.load %arg13[%c0_24, %c0_25] : memref<32x1xf32, #tpu.memory_space<vmem>>, vector<32x1xf32>
      tpu.vector_store %arg13[%c0_24, %c0_25], %41 {strides = array<i32>} : memref<32x1xf32, #tpu.memory_space<vmem>>, vector<32x1xf32>,
    } else {
    }
    %c1_i32_6 = arith.constant 1 : i32
    %13 = arith.cmpi eq, %arg0, %c1_i32_6 : i32
    %14 = arith.extui %13 : i1 to i32
    %c0_i32_7 = arith.constant 0 : i32
    %15 = arith.cmpi ne, %14, %c0_i32_7 : i32
    scf.if %15 {
      %c0 = arith.constant 0 : index
      %c0_12 = arith.constant 0 : index
      %24 = vector.load %arg3[%c0, %c0_12] : memref<32x15xf32, #tpu.memory_space<vmem>>, vector<32x15xf32>
      %c0_13 = arith.constant 0 : index
      %c0_14 = arith.constant 0 : index
      %25 = vector.load %arg2[%c0_13, %c0_14] : memref<15x128xf32, #tpu.memory_space<vmem>>, vector<15x128xf32>
      %cst = arith.constant dense<0.000000e+00> : vector<32x128xf32>
      %26 = tpu.matmul %24, %25, %cst {dimension_numbers = #tpu.dot_dimension_numbers<[1], [0], [0], [1], [0, 0, 1, 1], [], []>} : vector<32x15xf32>, vector<15x128xf32>, vector<32x128xf32> -> vector<32x128xf32>
      %c0_15 = arith.constant 0 : index
      %c0_16 = arith.constant 0 : index
      %27 = vector.load %arg12[%c0_15, %c0_16] : memref<32x1xf32, #tpu.memory_space<vmem>>, vector<32x1xf32>
      %28 = vector.broadcast %27 : vector<32x1xf32> to vector<32x128xf32>
      %29 = arith.mulf %26, %28 : vector<32x128xf32>
      %c0_17 = arith.constant 0 : index
      %c0_18 = arith.constant 0 : index
      %30 = vector.load %arg13[%c0_17, %c0_18] : memref<32x1xf32, #tpu.memory_space<vmem>>, vector<32x1xf32>
      %31 = vector.broadcast %30 : vector<32x1xf32> to vector<32x128xf32>
      %32 = arith.addf %29, %31 : vector<32x128xf32>
      %cst_19 = arith.constant 2.000000e-01 : f32
      %33 = vector.broadcast %cst_19 : f32 to vector<32x128xf32>
      %34 = arith.mulf %33, %32 : vector<32x128xf32>
      %35 = arith.maximumf %32, %34 : vector<32x128xf32>
      %c0_20 = arith.constant 0 : index
      %c0_21 = arith.constant 0 : index
      %36 = vector.load %arg4[%c0_20, %c0_21] : memref<32x32xf32, #tpu.memory_space<vmem>>, vector<32x32xf32>
      %cst_22 = arith.constant dense<0.000000e+00> : vector<32x128xf32>
      %37 = tpu.matmul %36, %35, %cst_22 {dimension_numbers = #tpu.dot_dimension_numbers<[1], [0], [0], [1], [0, 0, 1, 1], [], []>} : vector<32x32xf32>, vector<32x128xf32>, vector<32x128xf32> -> vector<32x128xf32>
      %c0_23 = arith.constant 0 : index
      %c0_24 = arith.constant 0 : index
      %38 = vector.load %arg14[%c0_23, %c0_24] : memref<32x1xf32, #tpu.memory_space<vmem>>, vector<32x1xf32>
      %cst_25 = arith.constant dense<0.000000e+00> : vector<32xf32>
      %39 = vector.multi_reduction <add>, %37, %cst_25 [1] : vector<32x128xf32> to vector<32xf32>
      %40 = vector.shape_cast %39 : vector<32xf32> to vector<32x1xf32>
      %41 = arith.addf %38, %40 : vector<32x1xf32>
      %c0_26 = arith.constant 0 : index
      %c0_27 = arith.constant 0 : index
      %42 = vector.load %arg14[%c0_26, %c0_27] : memref<32x1xf32, #tpu.memory_space<vmem>>, vector<32x1xf32>
      tpu.vector_store %arg14[%c0_26, %c0_27], %41 {strides = array<i32>} : memref<32x1xf32, #tpu.memory_space<vmem>>, vector<32x1xf32>,
      %c0_28 = arith.constant 0 : index
      %c0_29 = arith.constant 0 : index
      %43 = vector.load %arg15[%c0_28, %c0_29] : memref<32x1xf32, #tpu.memory_space<vmem>>, vector<32x1xf32>
      %44 = arith.mulf %37, %37 : vector<32x128xf32>
      %cst_30 = arith.constant dense<0.000000e+00> : vector<32xf32>
      %45 = vector.multi_reduction <add>, %44, %cst_30 [1] : vector<32x128xf32> to vector<32xf32>
      %46 = vector.shape_cast %45 : vector<32xf32> to vector<32x1xf32>
      %47 = arith.addf %43, %46 : vector<32x1xf32>
      %c0_31 = arith.constant 0 : index
      %c0_32 = arith.constant 0 : index
      %48 = vector.load %arg15[%c0_31, %c0_32] : memref<32x1xf32, #tpu.memory_space<vmem>>, vector<32x1xf32>
      tpu.vector_store %arg15[%c0_31, %c0_32], %47 {strides = array<i32>} : memref<32x1xf32, #tpu.memory_space<vmem>>, vector<32x1xf32>,
    } else {
    }
    %c2_i32 = arith.constant 2 : i32
    %16 = arith.cmpi eq, %arg0, %c2_i32 : i32
    %c0_i32_8 = arith.constant 0 : i32
    %17 = arith.cmpi eq, %arg1, %c0_i32_8 : i32
    %18 = arith.andi %16, %17 : i1
    %19 = arith.extui %18 : i1 to i32
    %c0_i32_9 = arith.constant 0 : i32
    %20 = arith.cmpi ne, %19, %c0_i32_9 : i32
    scf.if %20 {
      %c0 = arith.constant 0 : index
      %c0_12 = arith.constant 0 : index
      %24 = vector.load %arg14[%c0, %c0_12] : memref<32x1xf32, #tpu.memory_space<vmem>>, vector<32x1xf32>
      %c0_13 = arith.constant 0 : index
      %c0_14 = arith.constant 0 : index
      %25 = vector.load %arg15[%c0_13, %c0_14] : memref<32x1xf32, #tpu.memory_space<vmem>>, vector<32x1xf32>
      %c0_15 = arith.constant 0 : index
      %c0_16 = arith.constant 0 : index
      %26 = vector.load %arg13[%c0_15, %c0_16] : memref<32x1xf32, #tpu.memory_space<vmem>>, vector<32x1xf32>
      %cst = arith.constant 2.000000e-01 : f32
      %27 = vector.broadcast %cst : f32 to vector<32x1xf32>
      %28 = arith.mulf %27, %26 : vector<32x1xf32>
      %29 = arith.maximumf %26, %28 : vector<32x1xf32>
      %c0_17 = arith.constant 0 : index
      %c0_18 = arith.constant 0 : index
      %30 = vector.load %arg4[%c0_17, %c0_18] : memref<32x32xf32, #tpu.memory_space<vmem>>, vector<32x32xf32>
      %cst_19 = arith.constant dense<0.000000e+00> : vector<32x1xf32>
      %31 = tpu.matmul %30, %29, %cst_19 {dimension_numbers = #tpu.dot_dimension_numbers<[1], [0], [0], [1], [0, 0, 1, 1], [], []>} : vector<32x32xf32>, vector<32x1xf32>, vector<32x1xf32> -> vector<32x1xf32>
      %cst_20 = arith.constant 1.200000e+02 : f32
      %32 = vector.broadcast %cst_20 : f32 to vector<32x1xf32>
      %33 = arith.mulf %32, %31 : vector<32x1xf32>
      %34 = arith.subf %24, %33 : vector<32x1xf32>
      %35 = arith.mulf %31, %31 : vector<32x1xf32>
      %cst_21 = arith.constant 1.200000e+02 : f32
      %36 = vector.broadcast %cst_21 : f32 to vector<32x1xf32>
      %37 = arith.mulf %36, %35 : vector<32x1xf32>
      %38 = arith.subf %25, %37 : vector<32x1xf32>
      %cst_22 = arith.constant 1.250000e-01 : f32
      %39 = vector.broadcast %cst_22 : f32 to vector<32x1xf32>
      %40 = arith.mulf %34, %39 : vector<32x1xf32>
      %cst_23 = arith.constant 1.250000e-01 : f32
      %41 = vector.broadcast %cst_23 : f32 to vector<32x1xf32>
      %42 = arith.mulf %38, %41 : vector<32x1xf32>
      %43 = arith.mulf %40, %40 : vector<32x1xf32>
      %44 = arith.subf %42, %43 : vector<32x1xf32>
      %cst_24 = arith.constant 0.000000e+00 : f32
      %45 = vector.broadcast %cst_24 : f32 to vector<32x1xf32>
      %46 = arith.maximumf %44, %45 : vector<32x1xf32>
      %c0_25 = arith.constant 0 : index
      %c0_26 = arith.constant 0 : index
      %47 = vector.load %arg8[%c0_25, %c0_26] : memref<32x1xf32, #tpu.memory_space<vmem>>, vector<32x1xf32>
      %cst_27 = arith.constant 9.99999974E-6 : f32
      %48 = vector.broadcast %cst_27 : f32 to vector<32x1xf32>
      %49 = arith.addf %46, %48 : vector<32x1xf32>
      %50 = math.rsqrt %49 : vector<32x1xf32>
      %51 = arith.mulf %47, %50 : vector<32x1xf32>
      %c0_28 = arith.constant 0 : index
      %c0_29 = arith.constant 0 : index
      %52 = vector.load %arg9[%c0_28, %c0_29] : memref<32x1xf32, #tpu.memory_space<vmem>>, vector<32x1xf32>
      %53 = arith.mulf %51, %40 : vector<32x1xf32>
      %54 = arith.subf %52, %53 : vector<32x1xf32>
      %c0_30 = arith.constant 0 : index
      %c0_31 = arith.constant 0 : index
      %55 = vector.load %arg14[%c0_30, %c0_31] : memref<32x1xf32, #tpu.memory_space<vmem>>, vector<32x1xf32>
      tpu.vector_store %arg14[%c0_30, %c0_31], %51 {strides = array<i32>} : memref<32x1xf32, #tpu.memory_space<vmem>>, vector<32x1xf32>,
      %c0_32 = arith.constant 0 : index
      %c0_33 = arith.constant 0 : index
      %56 = vector.load %arg15[%c0_32, %c0_33] : memref<32x1xf32, #tpu.memory_space<vmem>>, vector<32x1xf32>
      tpu.vector_store %arg15[%c0_32, %c0_33], %54 {strides = array<i32>} : memref<32x1xf32, #tpu.memory_space<vmem>>, vector<32x1xf32>,
    } else {
    }
    %c2_i32_10 = arith.constant 2 : i32
    %21 = arith.cmpi eq, %arg0, %c2_i32_10 : i32
    %22 = arith.extui %21 : i1 to i32
    %c0_i32_11 = arith.constant 0 : i32
    %23 = arith.cmpi ne, %22, %c0_i32_11 : i32
    scf.if %23 {
      %c0 = arith.constant 0 : index
      %c0_12 = arith.constant 0 : index
      %24 = vector.load %arg3[%c0, %c0_12] : memref<32x15xf32, #tpu.memory_space<vmem>>, vector<32x15xf32>
      %c0_13 = arith.constant 0 : index
      %c0_14 = arith.constant 0 : index
      %25 = vector.load %arg2[%c0_13, %c0_14] : memref<15x128xf32, #tpu.memory_space<vmem>>, vector<15x128xf32>
      %cst = arith.constant dense<0.000000e+00> : vector<32x128xf32>
      %26 = tpu.matmul %24, %25, %cst {dimension_numbers = #tpu.dot_dimension_numbers<[1], [0], [0], [1], [0, 0, 1, 1], [], []>} : vector<32x15xf32>, vector<15x128xf32>, vector<32x128xf32> -> vector<32x128xf32>
      %c0_15 = arith.constant 0 : index
      %c0_16 = arith.constant 0 : index
      %27 = vector.load %arg12[%c0_15, %c0_16] : memref<32x1xf32, #tpu.memory_space<vmem>>, vector<32x1xf32>
      %28 = vector.broadcast %27 : vector<32x1xf32> to vector<32x128xf32>
      %29 = arith.mulf %26, %28 : vector<32x128xf32>
      %c0_17 = arith.constant 0 : index
      %c0_18 = arith.constant 0 : index
      %30 = vector.load %arg13[%c0_17, %c0_18] : memref<32x1xf32, #tpu.memory_space<vmem>>, vector<32x1xf32>
      %31 = vector.broadcast %30 : vector<32x1xf32> to vector<32x128xf32>
      %32 = arith.addf %29, %31 : vector<32x128xf32>
      %cst_19 = arith.constant 2.000000e-01 : f32
      %33 = vector.broadcast %cst_19 : f32 to vector<32x128xf32>
      %34 = arith.mulf %33, %32 : vector<32x128xf32>
      %35 = arith.maximumf %32, %34 : vector<32x128xf32>
      %c0_20 = arith.constant 0 : index
      %c0_21 = arith.constant 0 : index
      %36 = vector.load %arg4[%c0_20, %c0_21] : memref<32x32xf32, #tpu.memory_space<vmem>>, vector<32x32xf32>
      %cst_22 = arith.constant dense<0.000000e+00> : vector<32x128xf32>
      %37 = tpu.matmul %36, %35, %cst_22 {dimension_numbers = #tpu.dot_dimension_numbers<[1], [0], [0], [1], [0, 0, 1, 1], [], []>} : vector<32x32xf32>, vector<32x128xf32>, vector<32x128xf32> -> vector<32x128xf32>
      %c0_23 = arith.constant 0 : index
      %c0_24 = arith.constant 0 : index
      %38 = vector.load %arg14[%c0_23, %c0_24] : memref<32x1xf32, #tpu.memory_space<vmem>>, vector<32x1xf32>
      %39 = vector.broadcast %38 : vector<32x1xf32> to vector<32x128xf32>
      %40 = arith.mulf %37, %39 : vector<32x128xf32>
      %c0_25 = arith.constant 0 : index
      %c0_26 = arith.constant 0 : index
      %41 = vector.load %arg15[%c0_25, %c0_26] : memref<32x1xf32, #tpu.memory_space<vmem>>, vector<32x1xf32>
      %42 = vector.broadcast %41 : vector<32x1xf32> to vector<32x128xf32>
      %43 = arith.addf %40, %42 : vector<32x128xf32>
      %cst_27 = arith.constant 2.000000e-01 : f32
      %44 = vector.broadcast %cst_27 : f32 to vector<32x128xf32>
      %45 = arith.mulf %44, %43 : vector<32x128xf32>
      %46 = arith.maximumf %43, %45 : vector<32x128xf32>
      %c0_28 = arith.constant 0 : index
      %c0_29 = arith.constant 0 : index
      %47 = vector.load %arg5[%c0_28, %c0_29] : memref<1x32xf32, #tpu.memory_space<vmem>>, vector<1x32xf32>
      %cst_30 = arith.constant dense<0.000000e+00> : vector<1x128xf32>
      %48 = tpu.matmul %47, %46, %cst_30 {dimension_numbers = #tpu.dot_dimension_numbers<[1], [0], [0], [1], [0, 0, 1, 1], [], []>} : vector<1x32xf32>, vector<32x128xf32>, vector<1x128xf32> -> vector<1x128xf32>
      %c0_31 = arith.constant 0 : index
      %c0_32 = arith.constant 0 : index
      %49 = vector.load %arg10[%c0_31, %c0_32] : memref<1x1xf32, #tpu.memory_space<vmem>>, vector<1x1xf32>
      %50 = vector.broadcast %49 : vector<1x1xf32> to vector<1x128xf32>
      %51 = arith.addf %48, %50 : vector<1x128xf32>
      %cst_33 = arith.constant 0.000000e+00 : f32
      %52 = vector.broadcast %cst_33 : f32 to vector<1x128xf32>
      %53 = arith.subf %52, %51 : vector<1x128xf32>
      %54 = math.exp %53 : vector<1x128xf32>
      %cst_34 = arith.constant 1.000000e+00 : f32
      %55 = vector.broadcast %cst_34 : f32 to vector<1x128xf32>
      %56 = arith.addf %55, %54 : vector<1x128xf32>
      %57 = tpu.reciprocal %56 {approx = true} : vector<1x128xf32> -> vector<1x128xf32>
      %c0_35 = arith.constant 0 : index
      %c0_36 = arith.constant 0 : index
      %58 = vector.load %arg11[%c0_35, %c0_36] : memref<1x128xf32, #tpu.memory_space<vmem>>, vector<1x128xf32>
      tpu.vector_store %arg11[%c0_35, %c0_36], %57 {strides = array<i32>} : memref<1x128xf32, #tpu.memory_space<vmem>>, vector<1x128xf32>,
    } else {
    }
    return
  }
  func.func @transform_0(%arg0: i32, %arg1: i32) -> (i32, i32) {
    %c0_i32 = arith.constant 0 : i32
    %c0_i32_0 = arith.constant 0 : i32
    return %c0_i32, %arg1 : i32, i32
  }
  func.func @transform_1(%arg0: i32, %arg1: i32) -> (i32, i32) {
    %c0_i32 = arith.constant 0 : i32
    %c0_i32_0 = arith.constant 0 : i32
    %c0_i32_1 = arith.constant 0 : i32
    return %c0_i32, %c0_i32_0 : i32, i32
  }
  func.func @transform_2(%arg0: i32, %arg1: i32) -> (i32, i32) {
    %c0_i32 = arith.constant 0 : i32
    %c0_i32_0 = arith.constant 0 : i32
    %c0_i32_1 = arith.constant 0 : i32
    return %c0_i32, %c0_i32_0 : i32, i32
  }
  func.func @transform_3(%arg0: i32, %arg1: i32) -> (i32, i32) {
    %c0_i32 = arith.constant 0 : i32
    %c0_i32_0 = arith.constant 0 : i32
    %c0_i32_1 = arith.constant 0 : i32
    return %c0_i32, %c0_i32_0 : i32, i32
  }
  func.func @transform_4(%arg0: i32, %arg1: i32) -> (i32, i32) {
    %c0_i32 = arith.constant 0 : i32
    %c0_i32_0 = arith.constant 0 : i32
    %c0_i32_1 = arith.constant 0 : i32
    return %c0_i32, %c0_i32_0 : i32, i32
  }
  func.func @transform_5(%arg0: i32, %arg1: i32) -> (i32, i32) {
    %c0_i32 = arith.constant 0 : i32
    %c0_i32_0 = arith.constant 0 : i32
    %c0_i32_1 = arith.constant 0 : i32
    return %c0_i32, %c0_i32_0 : i32, i32
  }
  func.func @transform_6(%arg0: i32, %arg1: i32) -> (i32, i32) {
    %c0_i32 = arith.constant 0 : i32
    %c0_i32_0 = arith.constant 0 : i32
    %c0_i32_1 = arith.constant 0 : i32
    return %c0_i32, %c0_i32_0 : i32, i32
  }
  func.func @transform_7(%arg0: i32, %arg1: i32) -> (i32, i32) {
    %c0_i32 = arith.constant 0 : i32
    %c0_i32_0 = arith.constant 0 : i32
    %c0_i32_1 = arith.constant 0 : i32
    return %c0_i32, %c0_i32_0 : i32, i32
  }
  func.func @transform_8(%arg0: i32, %arg1: i32) -> (i32, i32) {
    %c0_i32 = arith.constant 0 : i32
    %c0_i32_0 = arith.constant 0 : i32
    %c0_i32_1 = arith.constant 0 : i32
    return %c0_i32, %c0_i32_0 : i32, i32
  }
  func.func @transform_9(%arg0: i32, %arg1: i32) -> (i32, i32) {
    %c0_i32 = arith.constant 0 : i32
    %c0_i32_0 = arith.constant 0 : i32
    return %c0_i32, %arg1 : i32, i32
  }
}

</mosaic_0001>

<bundles_post_ra>
// kernel: tpu_custom_call.1
= control target key start
LH: loop header
LB: loop body
LE: loop exit
PB: predicated region body
PF: predicated region fallthrough
CT: control target
= control target key end

     0   :  { %s2287_s0 = inlined_call_operand.vmem [shape: f32[15,128], index: 0, kind: input, shape index: {}]   ;;  %s2288_s1 = inlined_call_operand.vmem [shape: f32[32,15], index: 1, kind: input, shape index: {}]   ;;  %s2289_s2 = inlined_call_operand.vmem [shape: f32[32,32], index: 2, kind: input, shape index: {}]   ;;  %s2290_s3 = inlined_call_operand.vmem [shape: f32[1,32], index: 3, kind: input, shape index: {}]   ;;  %s2291_s4 = inlined_call_operand.vmem [shape: f32[32,1], index: 4, kind: input, shape index: {}]   ;;  %s2292_s5 = inlined_call_operand.vmem [shape: f32[32,1], index: 5, kind: input, shape index: {}]   ;;  %s2293_s6 = inlined_call_operand.vmem [shape: f32[32,1], index: 6, kind: input, shape index: {}]   ;;  %s2294_s7 = inlined_call_operand.vmem [shape: f32[32,1], index: 7, kind: input, shape index: {}]   ;;  %s2295_s8 = inlined_call_operand.<no memory space> [shape: f32[1,1], index: 8, kind: input, shape index: {}]   ;;  %s2296_s9 = inlined_call_operand.hbm [shape: f32[1,128], index: 9, kind: output, shape index: {}]  }
   0x1   :  { %v14_v0 = vstv %s2295_s8 }
   0x2   :  { %15 = vst [vmem:[#allocation6] sm:$0x1] %v14_v0 }
   0x3   :  { %16 = vsyncpa [#allocation8], 0  ;;  %s2013_s11 = smov 0   ;;  %s2015_s12 = smov 0  }
   0x4   :  { %s2017_s13 = smov 0  }
   0x5 LB: > { %s1603_s8 = sadd.s32 4294967295, %s1948_s13   ;;  %s34_s14 = sadd.s32 1, %s1944_s12  ;;  %s1948_s13 = sphi %s2017_s13, %s22_s13   ;;  %s1944_s12 = sphi %s2015_s12, %s2299_s12   ;;  %s1940_s11 = sphi %s2013_s11, %s2298_s11  }
   0x6   : > { %p36_p0 = scmp.ge.s32.totalorder %s34_s14, 3  ;;  %p1606_p1 = scmp.ge.s32.totalorder %s1948_s13, 1 }
   0x7   : > { %p301_p2 = scmp.lt.s32.totalorder %s1948_s13, 4 }
   0x8   : > { %s2301_s14 = smov (%p36_p0, %s34_s14), 0 }
   0x9   : > { %p302_p3 = pnand %p1606_p1, %p301_p2 }
   0xa   : > { %p335_p4 = scmp.eq.s32.totalorder (!%p302_p3), %s1940_s11, 0 }
   0xb   : > { %305 = sbr.rel (%p302_p3) target bundleno = 2051 (0x803), region = 56 }
  0x12   : > { %340 = sbr.rel (!%p335_p4) target bundleno = 27 (0x1b), region = 60  ;;  %vm341_vm0 = vcmask (%p335_p4), 7168   ;;  %v1950_v1 = vmov (%p335_p4), 0.0  }
  0x13   : > { %342 = vst.msk [vmem:[#allocation2] sm:$0xff] (%p335_p4), %vm341_vm0, %v1950_v1  ;;  %343 = vst.msk [vmem:[#allocation2 + $0x8] sm:$0xff] (%p335_p4), %vm341_vm0, %v1950_v1 }
  0x14   : > { %344 = vst.msk [vmem:[#allocation2 + $0x10] sm:$0xff] (%p335_p4), %vm341_vm0, %v1950_v1  ;;  %345 = vst.msk [vmem:[#allocation2 + $0x18] sm:$0xff] (%p335_p4), %vm341_vm0, %v1950_v1 }
  0x15   : > { %346 = vst.msk [vmem:[#allocation3] sm:$0xff] (%p335_p4), %vm341_vm0, %v1950_v1  ;;  %347 = vst.msk [vmem:[#allocation3 + $0x8] sm:$0xff] (%p335_p4), %vm341_vm0, %v1950_v1 }
  0x16   : > { %348 = vst.msk [vmem:[#allocation3 + $0x10] sm:$0xff] (%p335_p4), %vm341_vm0, %v1950_v1  ;;  %349 = vst.msk [vmem:[#allocation3 + $0x18] sm:$0xff] (%p335_p4), %vm341_vm0, %v1950_v1 }
  0x17   : > { %350 = vst.msk [vmem:[#allocation4] sm:$0xff] (%p335_p4), %vm341_vm0, %v1950_v1  ;;  %351 = vst.msk [vmem:[#allocation4 + $0x8] sm:$0xff] (%p335_p4), %vm341_vm0, %v1950_v1 }
  0x18   : > { %352 = vst.msk [vmem:[#allocation4 + $0x10] sm:$0xff] (%p335_p4), %vm341_vm0, %v1950_v1  ;;  %353 = vst.msk [vmem:[#allocation4 + $0x18] sm:$0xff] (%p335_p4), %vm341_vm0, %v1950_v1 }
  0x19   : > { %354 = vst.msk [vmem:[#allocation5] sm:$0xff] %vm341_vm0, %v1950_v1  ;;  %355 = vst.msk [vmem:[#allocation5 + $0x8] sm:$0xff] %vm341_vm0, %v1950_v1 }
  0x1a   : > { %356 = vst.msk [vmem:[#allocation5 + $0x10] sm:$0xff] %vm341_vm0, %v1950_v1  ;;  %357 = vst.msk [vmem:[#allocation5 + $0x18] sm:$0xff] %vm341_vm0, %v1950_v1 }
  0x1b PF: > { %p1608_p5 = scmp.ne.s32.totalorder %s1940_s11, 0 }
  0x1c   : > { %v365_v2 = vld [vmem:[%s2287_s0] sm:$0xff] (!%p1608_p5)  ;;  %v366_v3 = vld [vmem:[%s2287_s0 + $0x8] sm:$0x7f] (!%p1608_p5)  ;;  %vm380_vm1 = vcmask (!%p1608_p5), 1046528   ;;  %vm1951_vm2 = vmmov (!%p1608_p5), 1   ;;  %vm367_vm4 = vcmask (!%p1608_p5), 121856  }
  0x1d   : > { %360 = sbr.rel (%p1608_p5) target bundleno = 404 (0x194), region = 64  ;;  %v361_v4 = vld [vmem:[%s2288_s1] sm:$0xff] (!%p1608_p5)  ;;  %v1778_v5 = vpack.c.bf16 (!%p1608_p5), %v366_v3, %v365_v2  ;;  %vm1779_vm3 = vmpackc.low (!%p1608_p5), %vm380_vm1, %vm1951_vm2  ;;  %v363_v6 = vld [vmem:[%s2288_s1 + $0x10] sm:$0xff] (!%p1608_p5)  ;;  %vm485_vm5 = vcmask (!%p1608_p5), 7168  }
  0x1e   : > { %1699 = vmatprep.mubr.msk.f32.mxu0 (!%p1608_p5), %vm367_vm4, %v361_v4  ;;  %1702 = vmatprep.mubr.msk.f32.mxu1 (!%p1608_p5), %vm367_vm4, %v363_v6  ;;  %v362_v7 = vld [vmem:[%s2288_s1 + $0x8] sm:$0xff] (!%p1608_p5)  ;;  %v364_v8 = vld [vmem:[%s2288_s1 + $0x18] sm:$0xff] (!%p1608_p5)  ;;  %v471_v23 = vld [vmem:[#allocation2 + $0x10] sm:$0xff] (!%p1608_p5) }
  0x1f   : > { %1780 = vmatprep.subr.msk.bf16.mxu0 (!%p1608_p5), %vm1779_vm3, %v1778_v5  ;;  %1826 = vmatprep.subr.msk.bf16.mxu1 (!%p1608_p5), %vm1779_vm3, %v1778_v5  ;;  %v472_v17 = vld [vmem:[#allocation2 + $0x18] sm:$0xff] (!%p1608_p5)  ;;  %v470_v18 = vld [vmem:[#allocation2 + $0x8] sm:$0xff] (!%p1608_p5)  ;;  %v469_v24 = vld [vmem:[#allocation2] sm:$0xff] (!%p1608_p5) }
  0x20   : > { %1783 = vmatpush3.bf16.msk.msra.mxu0 (!%p1608_p5), %vm1779_vm3, %v1778_v5  ;;  %1827 = vmatpush3.bf16.msk.msra.mxu1 (!%p1608_p5), %vm1779_vm3, %v1778_v5  ;;  %v491_v29 = vld [vmem:[#allocation3 + $0x8] sm:$0xff] (!%p1608_p5)  ;;  %v490_v30 = vld [vmem:[#allocation3] sm:$0xff] (!%p1608_p5)  ;;  %v493_v35 = vld [vmem:[#allocation3 + $0x18] sm:$0xff] (!%p1608_p5) }
  0x21   : > { %v492_v36 = vld [vmem:[#allocation3 + $0x10] sm:$0xff] (!%p1608_p5) }
  0x23   : > { %1700 = vmatmul.mubr.msk.f32.vlgmr.msra.gmra.mrb[0].mxu0 (!%p1608_p5), %vm367_vm4, %v362_v7  ;;  %1703 = vmatmul.mubr.msk.f32.vlgmr.msra.gmra.mrb[0].mxu1 (!%p1608_p5), %vm367_vm4, %v364_v8 }
  0xf6   : > { %v1701_v9 = vpop.f32.mrb[0].mxu0  ;;  %v1704_v10 = vpop.f32.mrb[0].mxu1 }
  0xf7   : > { %479 = vadd.xlane.f32.xlu1 %v1704_v10  ;;  %v460_v11 = vpop.f32.mrb[1].mxu1  ;;  %475 = vadd.xlane.f32.xlu0 %v1701_v9  ;;  %v450_v12 = vpop.f32.mrb[1].mxu0  ;;  %v495_v14 = vmul.f32 %v1701_v9, %v1701_v9  ;;  %v497_v16 = vmul.f32 %v1704_v10, %v1704_v10 }
  0xf8   : > { %v494_v13 = vmul.f32 %v450_v12, %v450_v12  ;;  %v496_v15 = vmul.f32 %v460_v11, %v460_v11 }
  0xfb   : > { %477 = vadd.xlane.f32.xlu1 %v460_v11  ;;  %473 = vadd.xlane.f32.xlu0 %v450_v12 }
  0xff   : > { %500 = vadd.xlane.f32.xlu1 %v495_v14  ;;  %498 = vadd.xlane.f32.xlu0 %v494_v13 }
 0x103   : > { %504 = vadd.xlane.f32.xlu1 %v497_v16  ;;  %502 = vadd.xlane.f32.xlu0 %v496_v15 }
 0x184   : > { %v480_v19 = vpop.xlane.xlu1 %479  ;;  %v476_v20 = vpop.xlane.xlu0 %475 }
 0x185   : > { %v484_v21 = vadd.f32 %v480_v19, %v472_v17  ;;  %v482_v22 = vadd.f32 %v476_v20, %v470_v18 }
 0x187   : > { %489 = vst.msk [vmem:[#allocation2 + $0x18] sm:$0xff] %vm485_vm5, %v484_v21  ;;  %487 = vst.msk [vmem:[#allocation2 + $0x8] sm:$0xff] %vm485_vm5, %v482_v22 }
 0x188   : > { %v478_v25 = vpop.xlane.xlu1 %477  ;;  %v474_v26 = vpop.xlane.xlu0 %473 }
 0x189   : > { %v483_v27 = vadd.f32 %v478_v25, %v471_v23  ;;  %v481_v28 = vadd.f32 %v474_v26, %v469_v24 }
 0x18b   : > { %488 = vst.msk [vmem:[#allocation2 + $0x10] sm:$0xff] %vm485_vm5, %v483_v27  ;;  %486 = vst.msk [vmem:[#allocation2] sm:$0xff] %vm485_vm5, %v481_v28 }
 0x18c   : > { %v501_v31 = vpop.xlane.xlu1 %500  ;;  %v499_v32 = vpop.xlane.xlu0 %498 }
 0x18d   : > { %v507_v33 = vadd.f32 %v501_v31, %v491_v29  ;;  %v506_v34 = vadd.f32 %v499_v32, %v490_v30 }
 0x18f   : > { %511 = vst.msk [vmem:[#allocation3 + $0x8] sm:$0xff] %vm485_vm5, %v507_v33  ;;  %510 = vst.msk [vmem:[#allocation3] sm:$0xff] %vm485_vm5, %v506_v34 }
 0x190   : > { %v505_v37 = vpop.xlane.xlu1 %504  ;;  %v503_v38 = vpop.xlane.xlu0 %502 }
 0x191   : > { %v509_v39 = vadd.f32 %v505_v37, %v493_v35  ;;  %v508_v40 = vadd.f32 %v503_v38, %v492_v36 }
 0x193   : > { %513 = vst.msk [vmem:[#allocation3 + $0x18] sm:$0xff] %vm485_vm5, %v509_v39  ;;  %512 = vst.msk [vmem:[#allocation3 + $0x10] sm:$0xff] %vm485_vm5, %v508_v40 }
 0x194 PF: > { %p514_p6 = scmp.eq.s32.totalorder %s1940_s11, 1 }
 0x195   : > { %v519_v41 = vld [vmem:[#allocation2] sm:$0xff] (%p514_p6)  ;;  %v520_v45 = vld [vmem:[#allocation2 + $0x8] sm:$0xff] (%p514_p6)  ;;  %v521_v49 = vld [vmem:[#allocation2 + $0x10] sm:$0xff] (%p514_p6)  ;;  %vm575_vm6 = vcmask (%p514_p6), 7168  }
 0x196   : > { %518 = sbr.rel (!%p514_p6) target bundleno = 438 (0x1b6), region = 68  ;;  %v527_v42 = vld [vmem:[#allocation3] sm:$0xff] (%p514_p6)  ;;  %v523_v43 = vmul.f32 (%p514_p6), 0.125, %v519_v41  ;;  %v528_v46 = vld [vmem:[#allocation3 + $0x8] sm:$0xff] (%p514_p6)  ;;  %v524_v47 = vmul.f32 (%p514_p6), 0.125, %v520_v45  ;;  %v525_v52 = vmul.f32 (%p514_p6), 0.125, %v521_v49 }
 0x197   : > { %v531_v44 = vmul.f32 (%p514_p6), 0.125, %v527_v42  ;;  %v532_v48 = vmul.f32 (%p514_p6), 0.125, %v528_v46  ;;  %v522_v54 = vld [vmem:[#allocation2 + $0x18] sm:$0xff] (%p514_p6)  ;;  %v547_v9 = vld [vmem:[%s2291_s4] sm:$0xff] (%p514_p6)  ;;  %v548_v10 = vld [vmem:[%s2291_s4 + $0x8] sm:$0xff] (%p514_p6) }
 0x198   : > { %v535_v51 = vmul.f32 (%p514_p6), %v523_v43, %v523_v43  ;;  %v536_v56 = vmul.f32 (%p514_p6), %v524_v47, %v524_v47  ;;  %v526_v57 = vmul.f32 (%p514_p6), 0.125, %v522_v54  ;;  %v537_v60 = vmul.f32 (%p514_p6), %v525_v52, %v525_v52  ;;  %v549_v12 = vld [vmem:[%s2291_s4 + $0x10] sm:$0xff] (%p514_p6)  ;;  %v550_v15 = vld [vmem:[%s2291_s4 + $0x18] sm:$0xff] (%p514_p6)  ;;  %v563_v18 = vld [vmem:[%s2292_s5] sm:$0xff] (%p514_p6) }
 0x199   : > { %v564_v22 = vld [vmem:[%s2292_s5 + $0x8] sm:$0xff] (%p514_p6)  ;;  %v565_v25 = vld [vmem:[%s2292_s5 + $0x10] sm:$0xff] (%p514_p6)  ;;  %v566_v28 = vld [vmem:[%s2292_s5 + $0x18] sm:$0xff] (%p514_p6) }
 0x19a   : > { %v529_v50 = vld [vmem:[#allocation3 + $0x10] sm:$0xff] (%p514_p6)  ;;  %v530_v55 = vld [vmem:[#allocation3 + $0x18] sm:$0xff] (%p514_p6)  ;;  %v539_v59 = vsub.f32 (%p514_p6), %v531_v44, %v535_v51  ;;  %v540_v61 = vsub.f32 (%p514_p6), %v532_v48, %v536_v56  ;;  %v538_v62 = vmul.f32 (%p514_p6), %v526_v57, %v526_v57 }
 0x19b   : > { %v533_v53 = vmul.f32 (%p514_p6), 0.125, %v529_v50  ;;  %v534_v58 = vmul.f32 (%p514_p6), 0.125, %v530_v55 }
 0x19c   : > { %v543_v63 = vmax.f32 (%p514_p6), %v539_v59, 0.0  ;;  %v544_v1 = vmax.f32 (%p514_p6), %v540_v61, 0.0 }
 0x19d   : > { %v541_v0 = vsub.f32 %v533_v53, %v537_v60  ;;  %v542_v2 = vsub.f32 %v534_v58, %v538_v62 }
 0x19e   : > { %v551_v3 = vadd.f32 1e-05, %v543_v63  ;;  %v552_v5 = vadd.f32 1e-05, %v544_v1 }
 0x19f   : > { %v545_v4 = vmax.f32 %v541_v0, 0.0  ;;  %v546_v6 = vmax.f32 %v542_v2, 0.0 }
 0x1a0   : > { %1872 = vrsqrt.f32 %v551_v3 }
 0x1a1   : > { %v553_v7 = vadd.f32 1e-05, %v545_v4  ;;  %1874 = vrsqrt.f32 %v552_v5  ;;  %v554_v8 = vadd.f32 1e-05, %v546_v6 }
 0x1a3   : > { %1876 = vrsqrt.f32 %v553_v7 }
 0x1a4   : > { %1878 = vrsqrt.f32 %v554_v8 }
 0x1aa   : > { %v1873_v11 = vpop.eup %1872 }
 0x1ab   : > { %v1875_v13 = vpop.eup %1874  ;;  %v559_v14 = vmul.f32 %v1873_v11, %v547_v9 }
 0x1ac   : > { %v560_v17 = vmul.f32 %v1875_v13, %v548_v10 }
 0x1ad   : > { %v1877_v16 = vpop.eup %1876  ;;  %v567_v20 = vmul.f32 %v559_v14, %v523_v43  ;;  %576 = vst.msk [vmem:[#allocation2] sm:$0xff] %vm575_vm6, %v559_v14 }
 0x1ae   : > { %v1879_v19 = vpop.eup %1878  ;;  %v561_v21 = vmul.f32 %v1877_v16, %v549_v12  ;;  %v568_v23 = vmul.f32 %v560_v17, %v524_v47  ;;  %577 = vst.msk [vmem:[#allocation2 + $0x8] sm:$0xff] %vm575_vm6, %v560_v17 }
 0x1af   : > { %v562_v24 = vmul.f32 %v1879_v19, %v550_v15  ;;  %v571_v27 = vsub.f32 %v563_v18, %v567_v20 }
 0x1b0   : > { %v569_v26 = vmul.f32 %v561_v21, %v525_v52  ;;  %578 = vst.msk [vmem:[#allocation2 + $0x10] sm:$0xff] %vm575_vm6, %v561_v21  ;;  %v572_v30 = vsub.f32 %v564_v22, %v568_v23 }
 0x1b1   : > { %v570_v29 = vmul.f32 %v562_v24, %v526_v57  ;;  %579 = vst.msk [vmem:[#allocation2 + $0x18] sm:$0xff] %vm575_vm6, %v562_v24  ;;  %580 = vst.msk [vmem:[#allocation3] sm:$0xff] %vm575_vm6, %v571_v27 }
 0x1b2   : > { %v573_v31 = vsub.f32 %v565_v25, %v569_v26  ;;  %581 = vst.msk [vmem:[#allocation3 + $0x8] sm:$0xff] %vm575_vm6, %v572_v30 }
 0x1b3   : > { %v574_v32 = vsub.f32 %v566_v28, %v570_v29 }
 0x1b4   : > { %582 = vst.msk [vmem:[#allocation3 + $0x10] sm:$0xff] %vm575_vm6, %v573_v31 }
 0x1b5   : > { %583 = vst.msk [vmem:[#allocation3 + $0x18] sm:$0xff] %vm575_vm6, %v574_v32 }
 0x1b6 PF: > { %p1615_p7 = scmp.ne.s32.totalorder %s1940_s11, 1 }
 0x1b7   : > { %v591_v33 = vld [vmem:[%s2287_s0] sm:$0xff] (!%p1615_p7)  ;;  %v592_v34 = vld [vmem:[%s2287_s0 + $0x8] sm:$0x7f] (!%p1615_p7)  ;;  %vm606_vm7 = vcmask (!%p1615_p7), 1046528   ;;  %vm1952_vm8 = vmmov (!%p1615_p7), 1   ;;  %vm593_vm10 = vcmask (!%p1615_p7), 121856  }
 0x1b8   : > { %586 = sbr.rel (%p1615_p7) target bundleno = 1051 (0x41b), region = 72  ;;  %v587_v35 = vld [vmem:[%s2288_s1] sm:$0xff] (!%p1615_p7)  ;;  %v1784_v36 = vpack.c.bf16 (!%p1615_p7), %v592_v34, %v591_v33  ;;  %vm1785_vm9 = vmpackc.low (!%p1615_p7), %vm606_vm7, %vm1952_vm8  ;;  %v1953_v37 = vmov (!%p1615_p7), 0   ;;  %v588_v40 = vld [vmem:[%s2288_s1 + $0x8] sm:$0xff] (!%p1615_p7)  ;;  %vm763_vm11 = vcmask (!%p1615_p7), 261120   ;;  %vm877_vm12 = vcmask (!%p1615_p7), 7168  }
 0x1b9   : > { %1709 = vmatprep.mubr.msk.f32.mxu0 (!%p1615_p7), %vm593_vm10, %v587_v35  ;;  %1881 = vset.pattern.permute.xlu1 (!%p1615_p7), %v1953_v37  ;;  %v723_v38 = vld [vmem:[#allocation3] sm:$0xff] (!%p1615_p7)  ;;  %v589_v41 = vld [vmem:[%s2288_s1 + $0x10] sm:$0xff] (!%p1615_p7)  ;;  %v724_v42 = vld [vmem:[#allocation3 + $0x8] sm:$0xff] (!%p1615_p7) }
 0x1ba   : > { %v695_v39 = vld [vmem:[#allocation2] sm:$0xff] (!%p1615_p7)  ;;  %1786 = vmatprep.subr.msk.bf16.mxu0 (!%p1615_p7), %vm1785_vm9, %v1784_v36  ;;  %1880 = vset.pattern.permute.xlu0 (!%p1615_p7), %v1953_v37  ;;  %v696_v43 = vld [vmem:[#allocation2 + $0x8] sm:$0xff] (!%p1615_p7)  ;;  %v590_v44 = vld [vmem:[%s2288_s1 + $0x18] sm:$0xff] (!%p1615_p7) }
 0x1bb   : > { %1789 = vmatpush3.bf16.msk.msra.mxu0 (!%p1615_p7), %vm1785_vm9, %v1784_v36  ;;  %729 = vperm.xlu1 (!%p1615_p7), %1881, %v723_v38   ;;  %v698_v45 = vld [vmem:[#allocation2 + $0x18] sm:$0xff] (!%p1615_p7)  ;;  %v697_v46 = vld [vmem:[#allocation2 + $0x10] sm:$0xff] (!%p1615_p7)  ;;  %v759_v49 = vld [vmem:[%s2289_s2] sm:$0xff] (!%p1615_p7) }
 0x1bc   : > { %701 = vperm.xlu0 (!%p1615_p7), %1880, %v695_v39   ;;  %v726_v47 = vld [vmem:[#allocation3 + $0x18] sm:$0xff] (!%p1615_p7)  ;;  %v725_v48 = vld [vmem:[#allocation3 + $0x10] sm:$0xff] (!%p1615_p7)  ;;  %1723 = vmatprep.mubr.msk.f32.mxu1 (!%p1615_p7), %vm763_vm11, %v759_v49  ;;  %v760_v16 = vld [vmem:[%s2289_s2 + $0x8] sm:$0xff] (!%p1615_p7) }
 0x1bd   : > { %v761_v17 = vld [vmem:[%s2289_s2 + $0x10] sm:$0xff] (!%p1615_p7)  ;;  %v762_v18 = vld [vmem:[%s2289_s2 + $0x18] sm:$0xff] (!%p1615_p7)  ;;  %v862_v27 = vld [vmem:[#allocation4 + $0x8] sm:$0xff] (!%p1615_p7) }
 0x1be   : > { %1710 = vmatmul.mubr.msk.f32.vlgmr.msra.gmra.mrb[0].mxu0 (!%p1615_p7), %vm593_vm10, %v588_v40  ;;  %v861_v28 = vld [vmem:[#allocation4] sm:$0xff] (!%p1615_p7)  ;;  %v883_v34 = vld [vmem:[#allocation5 + $0x8] sm:$0xff] (!%p1615_p7)  ;;  %v884_v39 = vld [vmem:[#allocation5 + $0x10] sm:$0xff] (!%p1615_p7) }
 0x1bf   : > { %1712 = vmatprep.mubr.msk.f32.mxu0 %vm593_vm10, %v589_v41  ;;  %734 = vperm.xlu1 %1881, %v724_v42   ;;  %v882_v33 = vld [vmem:[#allocation5] sm:$0xff]  ;;  %v864_v40 = vld [vmem:[#allocation4 + $0x18] sm:$0xff] }
 0x1c0   : > { %706 = vperm.xlu0 %1880, %v696_v43  }
 0x1c2   : > { %1713 = vmatmul.mubr.msk.f32.gmra.mrb[2].mxu0 %vm593_vm10, %v590_v44 }
 0x1c3   : > { %716 = vperm.xlu1 %1881, %v698_v45   ;;  %v863_v45 = vld [vmem:[#allocation4 + $0x10] sm:$0xff] }
 0x1c4   : > { %711 = vperm.xlu0 %1880, %v697_v46  }
 0x1c7   : > { %744 = vperm.xlu1 %1881, %v726_v47  }
 0x1c8   : > { %739 = vperm.xlu0 %1880, %v725_v48   ;;  %v885_v48 = vld [vmem:[#allocation5 + $0x18] sm:$0xff] }
 0x23a   : > { %v730_v50 = vpop.permute.xlu1 %729 }
 0x23b   : > { %v702_v51 = vpop.permute.xlu0 %701 }
 0x23e   : > { %v735_v52 = vpop.permute.xlu1 %734 }
 0x23f   : > { %v707_v53 = vpop.permute.xlu0 %706 }
 0x242   : > { %v717_v54 = vpop.permute.xlu1 %716 }
 0x243   : > { %v712_v56 = vpop.permute.xlu0 %711 }
 0x246   : > { %v745_v2 = vpop.permute.xlu1 %744 }
 0x247   : > { %v740_v5 = vpop.permute.xlu0 %739 }
 0x291   : > { %v1711_v55 = vpop.f32.mrb[0].mxu0 }
 0x292   : > { %v720_v57 = vmul.f32 %v1711_v55, %v707_v53  ;;  %v676_v58 = vpop.f32.mrb[1].mxu0 }
 0x293   : > { %v719_v59 = vmul.f32 %v702_v51, %v676_v58 }
 0x294   : > { %v748_v60 = vadd.f32 %v735_v52, %v720_v57 }
 0x295   : > { %v747_v61 = vadd.f32 %v730_v50, %v719_v59  ;;  %v1714_v62 = vpop.f32.mrb[2].mxu0 }
 0x296   : > { %v752_v63 = vmul.f32 0.2, %v748_v60  ;;  %v722_v0 = vmul.f32 %v1714_v62, %v717_v54  ;;  %v686_v1 = vpop.f32.mrb[3].mxu0 }
 0x297   : > { %v751_v3 = vmul.f32 0.2, %v747_v61  ;;  %v721_v4 = vmul.f32 %v712_v56, %v686_v1 }
 0x298   : > { %v750_v6 = vadd.f32 %v745_v2, %v722_v0  ;;  %v756_v7 = vmax.f32 %v748_v60, %v752_v63 }
 0x299   : > { %v749_v8 = vadd.f32 %v740_v5, %v721_v4  ;;  %v755_v9 = vmax.f32 %v747_v61, %v751_v3 }
 0x29a   : > { %v754_v10 = vmul.f32 0.2, %v750_v6 }
 0x29b   : > { %v753_v11 = vmul.f32 0.2, %v749_v8  ;;  %v1790_v12 = vpack.c.bf16 %v756_v7, %v755_v9 }
 0x29c   : > { %v758_v13 = vmax.f32 %v750_v6, %v754_v10 }
 0x29d   : > { %v757_v14 = vmax.f32 %v749_v8, %v753_v11  ;;  %1791 = vmatprep.subr.bf16.mxu1 %v1790_v12 }
 0x29e   : > { %1793 = vmatpush3.bf16.msra.mxu1 %v1790_v12 }
 0x29f   : > { %v1794_v15 = vpack.c.bf16 %v758_v13, %v757_v14 }
 0x2a1   : > { %1795 = vmatprep.subr.bf16.mxu1 %v1794_v15 }
 0x2a2   : > { %1797 = vmatpush3.bf16.msra.mxu1 %v1794_v15 }
 0x2a5   : > { %1724 = vmatmul.mubr.msk.f32.vlgmr.msra.gmra.mrb[0].mxu1 %vm763_vm11, %v760_v16 }
 0x2a6   : > { %1726 = vmatprep.mubr.msk.f32.mxu1 %vm763_vm11, %v761_v17 }
 0x2a9   : > { %1727 = vmatmul.mubr.msk.f32.gmra.mrb[2].mxu1 %vm763_vm11, %v762_v18 }
 0x378   : > { %v1725_v19 = vpop.f32.mrb[0].mxu1 }
 0x379   : > { %867 = vadd.xlane.f32.xlu1 %v1725_v19  ;;  %v842_v20 = vpop.f32.mrb[1].mxu1  ;;  %v887_v22 = vmul.f32 %v1725_v19, %v1725_v19 }
 0x37a   : > { %865 = vadd.xlane.f32.xlu0 %v842_v20  ;;  %v886_v21 = vmul.f32 %v842_v20, %v842_v20 }
 0x37c   : > { %v1728_v23 = vpop.f32.mrb[2].mxu1 }
 0x37d   : > { %890 = vadd.xlane.f32.xlu1 %v886_v21  ;;  %v852_v24 = vpop.f32.mrb[3].mxu1  ;;  %v889_v26 = vmul.f32 %v1728_v23, %v1728_v23 }
 0x37e   : > { %892 = vadd.xlane.f32.xlu0 %v887_v22  ;;  %v888_v25 = vmul.f32 %v852_v24, %v852_v24 }
 0x381   : > { %894 = vadd.xlane.f32.xlu1 %v888_v25 }
 0x382   : > { %871 = vadd.xlane.f32.xlu0 %v1728_v23 }
 0x386   : > { %869 = vadd.xlane.f32.xlu0 %v852_v24 }
 0x38a   : > { %896 = vadd.xlane.f32.xlu0 %v889_v26 }
 0x406   : > { %v868_v29 = vpop.xlane.xlu1 %867 }
 0x407   : > { %v874_v30 = vadd.f32 %v868_v29, %v862_v27  ;;  %v866_v31 = vpop.xlane.xlu0 %865 }
 0x408   : > { %v873_v32 = vadd.f32 %v866_v31, %v861_v28 }
 0x409   : > { %879 = vst.msk [vmem:[#allocation4 + $0x8] sm:$0xff] %vm877_vm12, %v874_v30 }
 0x40a   : > { %878 = vst.msk [vmem:[#allocation4] sm:$0xff] %vm877_vm12, %v873_v32  ;;  %v891_v35 = vpop.xlane.xlu1 %890 }
 0x40b   : > { %v898_v36 = vadd.f32 %v891_v35, %v882_v33  ;;  %v893_v37 = vpop.xlane.xlu0 %892 }
 0x40c   : > { %v899_v38 = vadd.f32 %v893_v37, %v883_v34 }
 0x40d   : > { %902 = vst.msk [vmem:[#allocation5] sm:$0xff] %vm877_vm12, %v898_v36 }
 0x40e   : > { %903 = vst.msk [vmem:[#allocation5 + $0x8] sm:$0xff] %vm877_vm12, %v899_v38  ;;  %v895_v41 = vpop.xlane.xlu1 %894 }
 0x40f   : > { %v872_v42 = vpop.xlane.xlu0 %871  ;;  %v900_v43 = vadd.f32 %v895_v41, %v884_v39 }
 0x410   : > { %v876_v44 = vadd.f32 %v872_v42, %v864_v40 }
 0x411   : > { %904 = vst.msk [vmem:[#allocation5 + $0x10] sm:$0xff] %vm877_vm12, %v900_v43 }
 0x412   : > { %881 = vst.msk [vmem:[#allocation4 + $0x18] sm:$0xff] %vm877_vm12, %v876_v44 }
 0x413   : > { %v870_v46 = vpop.xlane.xlu0 %869 }
 0x414   : > { %v875_v47 = vadd.f32 %v870_v46, %v863_v45 }
 0x416   : > { %880 = vst.msk [vmem:[#allocation4 + $0x10] sm:$0xff] %vm877_vm12, %v875_v47 }
 0x417   : > { %v897_v49 = vpop.xlane.xlu0 %896 }
 0x418   : > { %v901_v50 = vadd.f32 %v897_v49, %v885_v48 }
 0x41a   : > { %905 = vst.msk [vmem:[#allocation5 + $0x18] sm:$0xff] %vm877_vm12, %v901_v50 }
 0x41b PF: > { %p906_p8 = scmp.eq.s32.totalorder %s1940_s11, 2 }
 0x41c   : > { %v919_v51 = vld [vmem:[#allocation3] sm:$0xff] (%p906_p8)  ;;  %v920_v52 = vld [vmem:[#allocation3 + $0x8] sm:$0xff] (%p906_p8)  ;;  %v921_v53 = vld [vmem:[#allocation3 + $0x10] sm:$0xff] (%p906_p8)  ;;  %vm935_vm13 = vcmask (%p906_p8), 261120   ;;  %vm1101_vm14 = vcmask (%p906_p8), 7168  }
 0x41d   : > { %910 = sbr.rel (!%p906_p8) target bundleno = 1314 (0x522), region = 76  ;;  %v923_v54 = vmul.f32 (%p906_p8), 0.2, %v919_v51  ;;  %v924_v55 = vmul.f32 (%p906_p8), 0.2, %v920_v52  ;;  %v922_v56 = vld [vmem:[#allocation3 + $0x18] sm:$0xff] (%p906_p8) }
 0x41e   : > { %v931_v57 = vld [vmem:[%s2289_s2] sm:$0xff] (%p906_p8)  ;;  %v925_v58 = vmul.f32 (%p906_p8), 0.2, %v921_v53  ;;  %v926_v59 = vmul.f32 (%p906_p8), 0.2, %v922_v56  ;;  %v933_v60 = vld [vmem:[%s2289_s2 + $0x10] sm:$0xff] (%p906_p8) }
 0x41f   : > { %1737 = vmatprep.mubr.msk.f32.mxu0 (%p906_p8), %vm935_vm13, %v931_v57  ;;  %v927_v61 = vmax.f32 (%p906_p8), %v919_v51, %v923_v54  ;;  %v928_v62 = vmax.f32 (%p906_p8), %v920_v52, %v924_v55  ;;  %1740 = vmatprep.mubr.msk.f32.mxu1 (%p906_p8), %vm935_vm13, %v933_v60  ;;  %v932_v3 = vld [vmem:[%s2289_s2 + $0x8] sm:$0xff] (%p906_p8)  ;;  %v934_v4 = vld [vmem:[%s2289_s2 + $0x18] sm:$0xff] (%p906_p8)  ;;  %v911_v13 = vld [vmem:[#allocation4] sm:$0xff] (%p906_p8) }
 0x420   : > { %v929_v63 = vmax.f32 (%p906_p8), %v921_v53, %v925_v58  ;;  %v930_v0 = vmax.f32 (%p906_p8), %v922_v56, %v926_v59  ;;  %v912_v5 = vld [vmem:[#allocation4 + $0x8] sm:$0xff] (%p906_p8)  ;;  %v914_v7 = vld [vmem:[#allocation4 + $0x18] sm:$0xff] (%p906_p8)  ;;  %v913_v15 = vld [vmem:[#allocation4 + $0x10] sm:$0xff] (%p906_p8) }
 0x421   : > { %v1798_v1 = vpack.c.bf16 (%p906_p8), %v928_v62, %v927_v61  ;;  %v916_v17 = vld [vmem:[#allocation5 + $0x8] sm:$0xff] (%p906_p8)  ;;  %v918_v18 = vld [vmem:[#allocation5 + $0x18] sm:$0xff] (%p906_p8)  ;;  %v915_v27 = vld [vmem:[#allocation5] sm:$0xff] (%p906_p8) }
 0x422   : > { %v1802_v2 = vpack.c.bf16 (%p906_p8), %v930_v0, %v929_v63  ;;  %v917_v28 = vld [vmem:[#allocation5 + $0x10] sm:$0xff] (%p906_p8)  ;;  %v1074_v61 = vld [vmem:[%s2293_s6 + $0x8] sm:$0xff] (%p906_p8)  ;;  %v1076_v62 = vld [vmem:[%s2293_s6 + $0x18] sm:$0xff] (%p906_p8) }
 0x423   : > { %1799 = vmatprep.subr.bf16.mxu0 (%p906_p8), %v1798_v1  ;;  %1828 = vmatprep.subr.bf16.mxu1 (%p906_p8), %v1798_v1  ;;  %v1073_v0 = vld [vmem:[%s2293_s6] sm:$0xff] (%p906_p8) }
 0x424   : > { %1801 = vmatpush3.bf16.msra.mxu0 %v1798_v1  ;;  %1830 = vmatpush3.bf16.msra.mxu1 %v1798_v1 }
 0x425   : > { %1803 = vmatprep.subr.bf16.mxu0 %v1802_v2  ;;  %1829 = vmatprep.subr.bf16.mxu1 %v1802_v2 }
 0x428   : > { %1805 = vmatpush3.bf16.msra.mxu0 %v1802_v2  ;;  %1831 = vmatpush3.bf16.msra.mxu1 %v1802_v2 }
 0x42b   : > { %1738 = vmatmul.mubr.msk.f32.vlgmr.msra.gmra.mrb[0].mxu0 %vm935_vm13, %v932_v3  ;;  %1741 = vmatmul.mubr.msk.f32.vlgmr.msra.gmra.mrb[0].mxu1 %vm935_vm13, %v934_v4  ;;  %v1075_v3 = vld [vmem:[%s2293_s6 + $0x10] sm:$0xff] }
 0x4fe   : > { %v1739_v6 = vpop.f32.mrb[0].mxu0  ;;  %v1742_v8 = vpop.f32.mrb[0].mxu1 }
 0x4ff   : > { %v1034_v9 = vmul.f32 120.0, %v1739_v6  ;;  %v1042_v10 = vmul.f32 %v1739_v6, %v1739_v6  ;;  %v1036_v11 = vmul.f32 120.0, %v1742_v8  ;;  %v1044_v12 = vmul.f32 %v1742_v8, %v1742_v8  ;;  %v1014_v14 = vpop.f32.mrb[1].mxu0  ;;  %v1024_v16 = vpop.f32.mrb[1].mxu1 }
 0x500   : > { %v1033_v19 = vmul.f32 120.0, %v1014_v14  ;;  %v1041_v20 = vmul.f32 %v1014_v14, %v1014_v14  ;;  %v1035_v21 = vmul.f32 120.0, %v1024_v16  ;;  %v1043_v22 = vmul.f32 %v1024_v16, %v1024_v16  ;;  %v1091_v16 = vld [vmem:[%s2294_s7 + $0x10] sm:$0xff] }
 0x501   : > { %v1038_v23 = vsub.f32 %v912_v5, %v1034_v9  ;;  %v1046_v24 = vmul.f32 120.0, %v1042_v10  ;;  %v1040_v25 = vsub.f32 %v914_v7, %v1036_v11  ;;  %v1048_v26 = vmul.f32 120.0, %v1044_v12  ;;  %v1090_v5 = vld [vmem:[%s2294_s7 + $0x8] sm:$0xff]  ;;  %v1092_v9 = vld [vmem:[%s2294_s7 + $0x18] sm:$0xff]  ;;  %v1089_v12 = vld [vmem:[%s2294_s7] sm:$0xff] }
 0x502   : > { %v1037_v29 = vsub.f32 %v911_v13, %v1033_v19  ;;  %v1045_v30 = vmul.f32 120.0, %v1041_v20  ;;  %v1039_v31 = vsub.f32 %v913_v15, %v1035_v21  ;;  %v1047_v32 = vmul.f32 120.0, %v1043_v22 }
 0x503   : > { %v1050_v33 = vsub.f32 %v916_v17, %v1046_v24  ;;  %v1054_v34 = vmul.f32 0.125, %v1038_v23  ;;  %v1052_v35 = vsub.f32 %v918_v18, %v1048_v26  ;;  %v1056_v36 = vmul.f32 0.125, %v1040_v25 }
 0x504   : > { %v1049_v37 = vsub.f32 %v915_v27, %v1045_v30  ;;  %v1053_v38 = vmul.f32 0.125, %v1037_v29  ;;  %v1051_v39 = vsub.f32 %v917_v28, %v1047_v32  ;;  %v1055_v40 = vmul.f32 0.125, %v1039_v31 }
 0x505   : > { %v1058_v41 = vmul.f32 0.125, %v1050_v33  ;;  %v1062_v42 = vmul.f32 %v1054_v34, %v1054_v34  ;;  %v1060_v43 = vmul.f32 0.125, %v1052_v35  ;;  %v1064_v44 = vmul.f32 %v1056_v36, %v1056_v36 }
 0x506   : > { %v1057_v45 = vmul.f32 0.125, %v1049_v37  ;;  %v1061_v46 = vmul.f32 %v1053_v38, %v1053_v38  ;;  %v1059_v47 = vmul.f32 0.125, %v1051_v39  ;;  %v1063_v48 = vmul.f32 %v1055_v40, %v1055_v40 }
 0x507   : > { %v1066_v49 = vsub.f32 %v1058_v41, %v1062_v42  ;;  %v1068_v50 = vsub.f32 %v1060_v43, %v1064_v44 }
 0x508   : > { %v1065_v51 = vsub.f32 %v1057_v45, %v1061_v46  ;;  %v1067_v52 = vsub.f32 %v1059_v47, %v1063_v48 }
 0x509   : > { %v1070_v53 = vmax.f32 %v1066_v49, 0.0  ;;  %v1072_v54 = vmax.f32 %v1068_v50, 0.0 }
 0x50a   : > { %v1069_v55 = vmax.f32 %v1065_v51, 0.0  ;;  %v1071_v56 = vmax.f32 %v1067_v52, 0.0 }
 0x50b   : > { %v1078_v57 = vadd.f32 1e-05, %v1070_v53  ;;  %v1080_v58 = vadd.f32 1e-05, %v1072_v54 }
 0x50c   : > { %v1077_v59 = vadd.f32 1e-05, %v1069_v55  ;;  %v1079_v60 = vadd.f32 1e-05, %v1071_v56 }
 0x50d   : > { %1882 = vrsqrt.f32 %v1078_v57 }
 0x50e   : > { %1884 = vrsqrt.f32 %v1080_v58 }
 0x50f   : > { %1886 = vrsqrt.f32 %v1077_v59 }
 0x510   : > { %1888 = vrsqrt.f32 %v1079_v60 }
 0x517   : > { %v1883_v63 = vpop.eup %1882 }
 0x518   : > { %v1885_v1 = vpop.eup %1884  ;;  %v1086_v2 = vmul.f32 %v1883_v63, %v1074_v61 }
 0x519   : > { %v1887_v4 = vpop.eup %1886  ;;  %v1088_v6 = vmul.f32 %v1885_v1, %v1076_v62 }
 0x51a   : > { %v1889_v7 = vpop.eup %1888  ;;  %v1094_v8 = vmul.f32 %v1086_v2, %v1054_v34  ;;  %1103 = vst.msk [vmem:[#allocation4 + $0x8] sm:$0xff] %vm1101_vm14, %v1086_v2  ;;  %v1085_v10 = vmul.f32 %v1887_v4, %v1073_v0 }
 0x51b   : > { %v1096_v11 = vmul.f32 %v1088_v6, %v1056_v36  ;;  %1105 = vst.msk [vmem:[#allocation4 + $0x18] sm:$0xff] %vm1101_vm14, %v1088_v6  ;;  %v1087_v13 = vmul.f32 %v1889_v7, %v1075_v3 }
 0x51c   : > { %v1098_v14 = vsub.f32 %v1090_v5, %v1094_v8  ;;  %v1093_v15 = vmul.f32 %v1085_v10, %v1053_v38  ;;  %1102 = vst.msk [vmem:[#allocation4] sm:$0xff] %vm1101_vm14, %v1085_v10 }
 0x51d   : > { %v1100_v17 = vsub.f32 %v1092_v9, %v1096_v11  ;;  %v1095_v18 = vmul.f32 %v1087_v13, %v1055_v40  ;;  %1104 = vst.msk [vmem:[#allocation4 + $0x10] sm:$0xff] %vm1101_vm14, %v1087_v13 }
 0x51e   : > { %1107 = vst.msk [vmem:[#allocation5 + $0x8] sm:$0xff] %vm1101_vm14, %v1098_v14  ;;  %v1097_v19 = vsub.f32 %v1089_v12, %v1093_v15 }
 0x51f   : > { %1109 = vst.msk [vmem:[#allocation5 + $0x18] sm:$0xff] %vm1101_vm14, %v1100_v17  ;;  %v1099_v20 = vsub.f32 %v1091_v16, %v1095_v18 }
 0x520   : > { %1106 = vst.msk [vmem:[#allocation5] sm:$0xff] %vm1101_vm14, %v1097_v19 }
 0x521   : > { %1108 = vst.msk [vmem:[#allocation5 + $0x10] sm:$0xff] %vm1101_vm14, %v1099_v20 }
 0x522 PF: > { %p1630_p9 = scmp.ne.s32.totalorder %s1940_s11, 2 }
 0x523   : > { %v1117_v21 = vld [vmem:[%s2287_s0] sm:$0xff] (!%p1630_p9)  ;;  %v1118_v22 = vld [vmem:[%s2287_s0 + $0x8] sm:$0x7f] (!%p1630_p9)  ;;  %vm1132_vm15 = vcmask (!%p1630_p9), 1046528   ;;  %vm1954_vm0 = vmmov (!%p1630_p9), 1   ;;  %vm1119_vm2 = vcmask (!%p1630_p9), 121856  }
 0x524   : > { %1112 = sbr.rel (%p1630_p9) target bundleno = 2026 (0x7ea), region = 80  ;;  %v1113_v23 = vld [vmem:[%s2288_s1] sm:$0xff] (!%p1630_p9)  ;;  %v1806_v24 = vpack.c.bf16 (!%p1630_p9), %v1118_v22, %v1117_v21  ;;  %vm1807_vm1 = vmpackc.low (!%p1630_p9), %vm1132_vm15, %vm1954_vm0  ;;  %v1955_v25 = vmov (!%p1630_p9), 0   ;;  %v1114_v28 = vld [vmem:[%s2288_s1 + $0x8] sm:$0xff] (!%p1630_p9)  ;;  %vm1289_vm3 = vcmask (!%p1630_p9), 261120   ;;  %v1956_v16 = vmov (!%p1630_p9), 0.0|0.0  }
 0x525   : > { %1747 = vmatprep.mubr.msk.f32.mxu0 (!%p1630_p9), %vm1119_vm2, %v1113_v23  ;;  %1890 = vset.pattern.permute.xlu0 (!%p1630_p9), %v1955_v25  ;;  %v1221_v26 = vld [vmem:[#allocation2] sm:$0xff] (!%p1630_p9)  ;;  %v1222_v29 = vld [vmem:[#allocation2 + $0x8] sm:$0xff] (!%p1630_p9)  ;;  %v1115_v30 = vld [vmem:[%s2288_s1 + $0x10] sm:$0xff] (!%p1630_p9)  ;;  %vm1957_vm4 = vmmov (!%p1630_p9), 0   ;;  %v1958_v17 = vmov (!%p1630_p9), 0.0  }
 0x526   : > { %v1249_v27 = vld [vmem:[#allocation3] sm:$0xff] (!%p1630_p9)  ;;  %1808 = vmatprep.subr.msk.bf16.mxu0 (!%p1630_p9), %vm1807_vm1, %v1806_v24  ;;  %1227 = vperm.xlu0 (!%p1630_p9), %1890, %v1221_v26   ;;  %v1250_v31 = vld [vmem:[#allocation3 + $0x8] sm:$0xff] (!%p1630_p9)  ;;  %v1116_v32 = vld [vmem:[%s2288_s1 + $0x18] sm:$0xff] (!%p1630_p9) }
 0x527   : > { %1811 = vmatpush3.bf16.msk.msra.mxu0 (!%p1630_p9), %vm1807_vm1, %v1806_v24  ;;  %1891 = vset.pattern.permute.xlu1 (!%p1630_p9), %v1955_v25  ;;  %v1223_v33 = vld [vmem:[#allocation2 + $0x10] sm:$0xff] (!%p1630_p9)  ;;  %v1224_v34 = vld [vmem:[#allocation2 + $0x18] sm:$0xff] (!%p1630_p9)  ;;  %v1387_v37 = vld [vmem:[#allocation4] sm:$0xff] (!%p1630_p9) }
 0x528   : > { %1255 = vperm.xlu1 (!%p1630_p9), %1891, %v1249_v27   ;;  %v1251_v35 = vld [vmem:[#allocation3 + $0x10] sm:$0xff] (!%p1630_p9)  ;;  %v1252_v36 = vld [vmem:[#allocation3 + $0x18] sm:$0xff] (!%p1630_p9)  ;;  %v1388_v38 = vld [vmem:[#allocation4 + $0x8] sm:$0xff] (!%p1630_p9)  ;;  %1820 = vmatprep.subr.bf16.mxu0 (!%p1630_p9), %v1956_v16 }
 0x529   : > { %v1415_v39 = vld [vmem:[#allocation5] sm:$0xff] (!%p1630_p9)  ;;  %v1416_v40 = vld [vmem:[#allocation5 + $0x8] sm:$0xff] (!%p1630_p9)  ;;  %v1389_v41 = vld [vmem:[#allocation4 + $0x10] sm:$0xff] (!%p1630_p9) }
 0x52a   : > { %1748 = vmatmul.mubr.msk.f32.vlgmr.msra.gmra.mrb[0].mxu0 (!%p1630_p9), %vm1119_vm2, %v1114_v28  ;;  %1232 = vperm.xlu0 (!%p1630_p9), %1890, %v1222_v29   ;;  %v1390_v42 = vld [vmem:[#allocation4 + $0x18] sm:$0xff] (!%p1630_p9)  ;;  %v1417_v43 = vld [vmem:[#allocation5 + $0x10] sm:$0xff] (!%p1630_p9)  ;;  %v1452_v45 = vld [vmem:[#allocation6] sm:$0x1] (!%p1630_p9) }
 0x52b   : > { %1750 = vmatprep.mubr.msk.f32.mxu0 %vm1119_vm2, %v1115_v30  ;;  %v1418_v44 = vld [vmem:[#allocation5 + $0x18] sm:$0xff]  ;;  %v1285_v46 = vld [vmem:[%s2289_s2] sm:$0xff]  ;;  %v1286_v13 = vld [vmem:[%s2289_s2 + $0x8] sm:$0xff] }
 0x52c   : > { %1260 = vperm.xlu1 %1891, %v1250_v31   ;;  %1761 = vmatprep.mubr.msk.f32.mxu1 %vm1289_vm3, %v1285_v46  ;;  %v1287_v14 = vld [vmem:[%s2289_s2 + $0x10] sm:$0xff]  ;;  %v1288_v15 = vld [vmem:[%s2289_s2 + $0x18] sm:$0xff] }
 0x52e   : > { %1751 = vmatmul.mubr.msk.f32.gmra.mrb[2].mxu0 %vm1119_vm2, %v1116_v32  ;;  %1237 = vperm.xlu0 %1890, %v1223_v33  }
 0x52f   : > { %1775 = vmatprep.mubr.msk.f32.mxu0 %vm1957_vm4, %v1958_v17 }
 0x530   : > { %1242 = vperm.xlu1 %1891, %v1224_v34  }
 0x532   : > { %1265 = vperm.xlu0 %1890, %v1251_v35  }
 0x534   : > { %1270 = vperm.xlu1 %1891, %v1252_v36  }
 0x536   : > { %1393 = vperm.xlu0 %1890, %v1387_v37  }
 0x538   : > { %1398 = vperm.xlu1 %1891, %v1388_v38  }
 0x53a   : > { %1421 = vperm.xlu0 %1890, %v1415_v39  }
 0x53c   : > { %1426 = vperm.xlu1 %1891, %v1416_v40  }
 0x53e   : > { %1403 = vperm.xlu0 %1890, %v1389_v41  }
 0x540   : > { %1408 = vperm.xlu1 %1891, %v1390_v42  }
 0x542   : > { %1431 = vperm.xlu0 %1890, %v1417_v43  }
 0x544   : > { %1436 = vperm.xlu1 %1891, %v1418_v44  }
 0x546   : > { %1455 = vperm.xlu0 %1890, %v1452_v45  }
 0x5a5   : > { %v1228_v48 = vpop.permute.xlu0 %1227 }
 0x5a7   : > { %v1256_v47 = vpop.permute.xlu1 %1255 }
 0x5a9   : > { %v1233_v50 = vpop.permute.xlu0 %1232 }
 0x5ab   : > { %v1261_v49 = vpop.permute.xlu1 %1260 }
 0x5ad   : > { %v1238_v53 = vpop.permute.xlu0 %1237 }
 0x5af   : > { %v1243_v51 = vpop.permute.xlu1 %1242 }
 0x5b1   : > { %v1266_v2 = vpop.permute.xlu0 %1265 }
 0x5b3   : > { %v1271_v63 = vpop.permute.xlu1 %1270 }
 0x5b5   : > { %v1394_v19 = vpop.permute.xlu0 %1393 }
 0x5b7   : > { %v1399_v18 = vpop.permute.xlu1 %1398 }
 0x5b9   : > { %v1422_v21 = vpop.permute.xlu0 %1421 }
 0x5bb   : > { %v1427_v20 = vpop.permute.xlu1 %1426 }
 0x5bd   : > { %v1404_v24 = vpop.permute.xlu0 %1403 }
 0x5bf   : > { %v1409_v22 = vpop.permute.xlu1 %1408 }
 0x5c1   : > { %v1432_v37 = vpop.permute.xlu0 %1431 }
 0x5c3   : > { %v1437_v34 = vpop.permute.xlu1 %1436 }
 0x5fd   : > { %v1749_v52 = vpop.f32.mrb[0].mxu0 }
 0x5fe   : > { %v1246_v54 = vmul.f32 %v1749_v52, %v1233_v50  ;;  %v1202_v55 = vpop.f32.mrb[1].mxu0  ;;  %v1456_v52 = vpop.permute.xlu0 %1455 }
 0x5ff   : > { %v1245_v56 = vmul.f32 %v1228_v48, %v1202_v55  ;;  %v1451_v48 = vld [vmem:[%s2290_s3] sm:$0x1] }
 0x600   : > { %v1274_v57 = vadd.f32 %v1261_v49, %v1246_v54  ;;  %v1458_v49 = vlaneseq }
 0x601   : > { %v1273_v58 = vadd.f32 %v1256_v47, %v1245_v56  ;;  %v1752_v59 = vpop.f32.mrb[2].mxu0 }
 0x602   : > { %v1278_v60 = vmul.f32 0.2, %v1274_v57  ;;  %v1248_v61 = vmul.f32 %v1752_v59, %v1243_v51  ;;  %v1212_v62 = vpop.f32.mrb[3].mxu0  ;;  %v1459_v50 = vshrl.u32 %v1458_v49, 7 }
 0x603   : > { %v1277_v0 = vmul.f32 0.2, %v1273_v58  ;;  %v1247_v1 = vmul.f32 %v1238_v53, %v1212_v62 }
 0x604   : > { %v1276_v3 = vadd.f32 %v1271_v63, %v1248_v61  ;;  %v1282_v4 = vmax.f32 %v1274_v57, %v1278_v60  ;;  %v1460_v51 = vsub.s32 0, %v1459_v50 }
 0x605   : > { %v1275_v5 = vadd.f32 %v1266_v2, %v1247_v1  ;;  %v1281_v6 = vmax.f32 %v1273_v58, %v1277_v0 }
 0x606   : > { %v1280_v7 = vmul.f32 0.2, %v1276_v3  ;;  %v1461_v53 = vrot.slane %v1456_v52, %v1460_v51 }
 0x607   : > { %v1279_v8 = vmul.f32 0.2, %v1275_v5  ;;  %v1812_v9 = vpack.c.bf16 %v1282_v4, %v1281_v6 }
 0x608   : > { %v1284_v10 = vmax.f32 %v1276_v3, %v1280_v7 }
 0x609   : > { %v1283_v11 = vmax.f32 %v1275_v5, %v1279_v8  ;;  %1813 = vmatprep.subr.bf16.mxu1 %v1812_v9 }
 0x60a   : > { %1815 = vmatpush3.bf16.msra.mxu1 %v1812_v9 }
 0x60b   : > { %v1816_v12 = vpack.c.bf16 %v1284_v10, %v1283_v11 }
 0x60d   : > { %1817 = vmatprep.subr.bf16.mxu1 %v1816_v12 }
 0x60e   : > { %1819 = vmatpush3.bf16.msra.mxu1 %v1816_v12 }
 0x611   : > { %1762 = vmatmul.mubr.msk.f32.vlgmr.msra.gmra.mrb[0].mxu1 %vm1289_vm3, %v1286_v13 }
 0x612   : > { %1764 = vmatprep.mubr.msk.f32.mxu1 %vm1289_vm3, %v1287_v14 }
 0x615   : > { %1765 = vmatmul.mubr.msk.f32.gmra.mrb[2].mxu1 %vm1289_vm3, %v1288_v15 }
 0x6e4   : > { %v1763_v23 = vpop.f32.mrb[0].mxu1 }
 0x6e5   : > { %v1412_v25 = vmul.f32 %v1763_v23, %v1399_v18  ;;  %v1368_v26 = vpop.f32.mrb[1].mxu1 }
 0x6e6   : > { %v1411_v27 = vmul.f32 %v1394_v19, %v1368_v26 }
 0x6e7   : > { %v1440_v28 = vadd.f32 %v1427_v20, %v1412_v25 }
 0x6e8   : > { %v1439_v29 = vadd.f32 %v1422_v21, %v1411_v27  ;;  %v1766_v30 = vpop.f32.mrb[2].mxu1 }
 0x6e9   : > { %v1444_v31 = vmul.f32 0.2, %v1440_v28  ;;  %v1414_v32 = vmul.f32 %v1766_v30, %v1409_v22  ;;  %v1378_v33 = vpop.f32.mrb[3].mxu1 }
 0x6ea   : > { %v1443_v35 = vmul.f32 0.2, %v1439_v29  ;;  %v1413_v36 = vmul.f32 %v1404_v24, %v1378_v33 }
 0x6eb   : > { %v1448_v38 = vmax.f32 %v1440_v28, %v1444_v31  ;;  %v1442_v39 = vadd.f32 %v1437_v34, %v1414_v32 }
 0x6ec   : > { %v1447_v40 = vmax.f32 %v1439_v29, %v1443_v35  ;;  %v1441_v41 = vadd.f32 %v1432_v37, %v1413_v36 }
 0x6ed   : > { %v1446_v42 = vmul.f32 0.2, %v1442_v39 }
 0x6ee   : > { %v1821_v43 = vpack.c.bf16 %v1448_v38, %v1447_v40  ;;  %v1445_v44 = vmul.f32 0.2, %v1441_v41 }
 0x6ef   : > { %v1450_v45 = vmax.f32 %v1442_v39, %v1446_v42 }
 0x6f0   : > { %v1449_v46 = vmax.f32 %v1441_v41, %v1445_v44  ;;  %1822 = vmatpush3.bf16.msra.mxu0 %v1821_v43 }
 0x6f1   : > { %1823 = vmatprep.subr.bf16.mxu0 %v1956_v16 }
 0x6f2   : > { %v1824_v47 = vpack.c.bf16 %v1450_v45, %v1449_v46 }
 0x6f4   : > { %1825 = vmatpush3.bf16.msra.mxu0 %v1824_v47 }
 0x6f7   : > { %1776 = vmatmul.mubr.msk.f32.vlgmr.msra.gmra.mrb[4].mxu0 %vm1289_vm3, %v1451_v48 }
 0x7ca   : > { %v1531_v54 = vpop.f32.mrb[4].mxu0 }
 0x7cb   : > { %v1532_v55 = vadd.f32 %v1531_v54, %v1461_v53  ;;  %v1777_v56 = vpop.f32.mrb[5].mxu0 }
 0x7cd   : > { %v1535_v57 = vsub.f32 0.0, %v1532_v55 }
 0x7cf   : > { %v1536_v58 = vmul.f32 1.442695, %v1535_v57 }
 0x7d1   : > { %1892 = vpow2.f32 %v1536_v58 }
 0x7db   : > { %v1893_v59 = vpop.eup %1892 }
 0x7dc   : > { %v1538_v60 = vadd.f32 1.0, %v1893_v59 }
 0x7de   : > { %1894 = vrcp.f32 %v1538_v60 }
 0x7e8   : > { %v1895_v61 = vpop.eup %1894 }
 0x7e9   : > { %1540 = vst [vmem:[#allocation7] sm:$0x1] %v1895_v61 }
 0x7ea PF: > { %p2252_p10 = scmp.eq.s32.totalorder %s1603_s8, 2  ;;  %s1959_s24 = smov [#allocation7]  }
 0x7eb   : > { %s1550_s11 = sshll.u32 %s1959_s24, 4  ;;  %s1551_s11 = int_to_ptr.vmem [resolvable:$true] %s1550_s11 }
 0x7ec   : > { %s1896_s25 = scalar_lea.vmem %s1551_s11, 16  ;;  %s1902_s26 = scalar_lea.vmem %s1551_s11, 32 }
 0x7ed   : > { %p1897_p11 = scmp.ne.s32.totalorder %s1551_s11, %s1896_s25  ;;  %p1903_p0 = scmp.lt.s32.totalorder %s1551_s11, %s1551_s11 }
 0x7ee   : > { %p1904_p1 = scmp.lt.s32.totalorder %s1902_s26, %s1896_s25 }
 0x7ef   : > { %p1898_p12 = pnand %p1897_p11, %p2252_p10 }
 0x7f0   : > { %p1905_p2 = por %p1904_p1, %p1903_p0 }
 0x7f1   : > { %p1899_p13 = pneg %p1898_p12 }
 0x7f3   : > { %p1906_p3 = pnand %p1905_p2, %p1899_p13 }
 0x7f5   : > { %1909 = shalt.err (!%p1906_p3)
}
 0x7f6   : > { %s1910_s28 = scalar_lea.hbm %s2296_s9, 16 }
 0x7f7   : > { %p1911_p4 = scmp.ne.s32.totalorder %s2296_s9, %s1910_s28  ;;  %p1916_p7 = scmp.lt.u32.totalorder %s1910_s28, %s2296_s9 }
 0x7f9   : > { %p1912_p5 = pnand %p1911_p4, %p2252_p10 }
 0x7fb   : > { %p1913_p6 = pneg %p1912_p5 }
 0x7fd   : > { %p1918_p8 = pnand %p1916_p7, %p1913_p6 }
 0x7ff   : > { %1921 = shalt.err (!%p1918_p8)
}
 0x800   : > { %1833 = dma.vmem_to_hbm [thread:$0]  (%p2252_p10), %s1551_s11, 16, %s2296_s9, [#allocation8]  }
 0x801   : > { %1935 = dma.done.wait (%p2252_p10), [#allocation8], 16  }
 0x802   : > { %1937 = vsyncadd (%p2252_p10), [#allocation8], 4294967280 }
 0x803 PF: > { %s22_s13 = sadd.s32 1, %s1948_s13   ;;  %s2298_s11 = smov %s1944_s12 }
 0x804   : > { %p19_p9 = scmp.ge.s32.totalorder %s22_s13, 5   ;;  %s2299_s12 = smov %s2301_s14 }
 0x806   :  { %21 = sbr.rel (!%p19_p9) target bundleno = 5 (0x5), region = 108 }
 0x80d   :  { %1563 = vsyncpa [#allocation8], 1 }
 0x80e   :  { %1565 = vsyncpa [#allocation8 + $0x1], 1 }

</bundles_post_ra>
